<compile_context>
chip_gen: v7x
topology: tpu7x:2x2x1
jax: 0.10.0
libtpu: 0.0.40
codegen_flags: <defaults>
</compile_context>

<pallas_src>
import math
import functools

import jax
import jax.numpy as jnp
from jax.experimental import pallas as pl
from jax.experimental.pallas import tpu as pltpu

PAD_TOKEN = 0
NEG_BIG = -1e9          # large finite negative instead of -inf
LN_EPS = 1e-5           # PyTorch nn.Transformer default


def _pick_row_tile(M):
    """Largest multiple-of-8 row tile that divides M and yields >= 2 grid steps
    (lets Mosaic shard rows across both v7x TensorCores); else full M."""
    if M % 8 != 0:
        return M
    best = M
    tm = 8
    while tm <= min(M, 512):
        if M % tm == 0 and M // tm >= 2:
            best = tm
        tm += 8
    return best


# ----------------------------------------------------------------------------
# Pallas kernels
# ----------------------------------------------------------------------------


def _linear_kernel(x_ref, w_ref, b_ref, o_ref):
    y = jnp.dot(x_ref[...], w_ref[...], preferred_element_type=jnp.float32)
    o_ref[...] = (y + b_ref[...]).astype(o_ref.dtype)


def linear(x, w, b):
    """x: (M, K), w: (K, N), b: (N,)  ->  (M, N), f32 accumulation on the MXU."""
    M, K = x.shape
    N = w.shape[1]
    tm = _pick_row_tile(M)
    return pl.pallas_call(
        _linear_kernel,
        grid=(M // tm,),
        in_specs=[
            pl.BlockSpec((tm, K), lambda i: (i, 0)),
            pl.BlockSpec((K, N), lambda i: (0, 0)),
            pl.BlockSpec((1, N), lambda i: (0, 0)),
        ],
        out_specs=pl.BlockSpec((tm, N), lambda i: (i, 0)),
        out_shape=jax.ShapeDtypeStruct((M, N), x.dtype),
        compiler_params=pltpu.CompilerParams(dimension_semantics=("parallel",)),
    )(x, w, b.reshape(1, N))


def _layernorm_body(y, g, b):
    mean = jnp.mean(y, axis=-1, keepdims=True)
    var = jnp.mean(jnp.square(y - mean), axis=-1, keepdims=True)
    return (y - mean) * jax.lax.rsqrt(var + LN_EPS) * g + b


def _ln_kernel(x_ref, g_ref, b_ref, o_ref):
    o_ref[...] = _layernorm_body(x_ref[...], g_ref[...], b_ref[...]).astype(o_ref.dtype)


def layernorm(x, gamma, beta):
    """x: (B, S, E) -> LayerNorm(x) over the last dim."""
    B, S, E = x.shape
    M = B * S
    tm = _pick_row_tile(M)
    out = pl.pallas_call(
        _ln_kernel,
        grid=(M // tm,),
        in_specs=[
            pl.BlockSpec((tm, E), lambda i: (i, 0)),
            pl.BlockSpec((1, E), lambda i: (0, 0)),
            pl.BlockSpec((1, E), lambda i: (0, 0)),
        ],
        out_specs=pl.BlockSpec((tm, E), lambda i: (i, 0)),
        out_shape=jax.ShapeDtypeStruct((M, E), x.dtype),
        compiler_params=pltpu.CompilerParams(dimension_semantics=("parallel",)),
    )(x.reshape(M, E), gamma.reshape(1, E), beta.reshape(1, E))
    return out.reshape(B, S, E)


def _proj_add_ln_kernel(x_ref, w_ref, b_ref, r_ref, g_ref, beta_ref, o_ref):
    # o = LayerNorm(x @ w + b + residual)
    y = jnp.dot(x_ref[...], w_ref[...], preferred_element_type=jnp.float32)
    y = y + b_ref[...] + r_ref[...]
    o_ref[...] = _layernorm_body(y, g_ref[...], beta_ref[...]).astype(o_ref.dtype)


def proj_add_layernorm(x, w, b, residual, gamma, beta):
    """Fused attention output projection + residual add + LayerNorm."""
    B, S, E = x.shape
    M = B * S
    tm = _pick_row_tile(M)
    out = pl.pallas_call(
        _proj_add_ln_kernel,
        grid=(M // tm,),
        in_specs=[
            pl.BlockSpec((tm, E), lambda i: (i, 0)),
            pl.BlockSpec((E, E), lambda i: (0, 0)),
            pl.BlockSpec((1, E), lambda i: (0, 0)),
            pl.BlockSpec((tm, E), lambda i: (i, 0)),
            pl.BlockSpec((1, E), lambda i: (0, 0)),
            pl.BlockSpec((1, E), lambda i: (0, 0)),
        ],
        out_specs=pl.BlockSpec((tm, E), lambda i: (i, 0)),
        out_shape=jax.ShapeDtypeStruct((M, E), x.dtype),
        compiler_params=pltpu.CompilerParams(dimension_semantics=("parallel",)),
    )(x.reshape(M, E), w, b.reshape(1, E), residual.reshape(M, E),
      gamma.reshape(1, E), beta.reshape(1, E))
    return out.reshape(B, S, E)


def _ffn_add_ln_kernel(x_ref, w1_ref, b1_ref, w2_ref, b2_ref, g_ref, beta_ref, o_ref):
    # o = LayerNorm(relu(x @ w1 + b1) @ w2 + b2 + x); hidden stays in VMEM/vregs
    x = x_ref[...]
    h = jnp.dot(x, w1_ref[...], preferred_element_type=jnp.float32) + b1_ref[...]
    h = jnp.maximum(h, 0.0)
    y = jnp.dot(h, w2_ref[...], preferred_element_type=jnp.float32) + b2_ref[...] + x
    o_ref[...] = _layernorm_body(y, g_ref[...], beta_ref[...]).astype(o_ref.dtype)


def ffn_add_layernorm(x, w1, b1, w2, b2, gamma, beta):
    """Fused feed-forward block + residual add + LayerNorm."""
    B, S, E = x.shape
    FF = w1.shape[1]
    M = B * S
    tm = _pick_row_tile(M)
    out = pl.pallas_call(
        _ffn_add_ln_kernel,
        grid=(M // tm,),
        in_specs=[
            pl.BlockSpec((tm, E), lambda i: (i, 0)),
            pl.BlockSpec((E, FF), lambda i: (0, 0)),
            pl.BlockSpec((1, FF), lambda i: (0, 0)),
            pl.BlockSpec((FF, E), lambda i: (0, 0)),
            pl.BlockSpec((1, E), lambda i: (0, 0)),
            pl.BlockSpec((1, E), lambda i: (0, 0)),
            pl.BlockSpec((1, E), lambda i: (0, 0)),
        ],
        out_specs=pl.BlockSpec((tm, E), lambda i: (i, 0)),
        out_shape=jax.ShapeDtypeStruct((M, E), x.dtype),
        compiler_params=pltpu.CompilerParams(dimension_semantics=("parallel",)),
    )(x.reshape(M, E), w1, b1.reshape(1, FF), w2, b2.reshape(1, E),
      gamma.reshape(1, E), beta.reshape(1, E))
    return out.reshape(B, S, E)


def _mha_attn_kernel(q_ref, k_ref, v_ref, bias_ref, o_ref, *, nhead, head_dim, scale):
    # All heads of one batch element; output written lane-dense as (Sq, H*D)=(Sq, E).
    q = q_ref[...]              # (Sq, E)
    k = k_ref[...]              # (Sk, E)
    v = v_ref[...]              # (Sk, E)
    bias = bias_ref[...]        # (Sq, Sk), shared across heads
    outs = []
    for h in range(nhead):      # static unroll, tiny H
        sl = slice(h * head_dim, (h + 1) * head_dim)
        qh, kh, vh = q[:, sl], k[:, sl], v[:, sl]
        # scores: contract on last dims -> no explicit K transpose
        s = jax.lax.dot_general(qh, kh, (((1,), (1,)), ((), ())),
                                preferred_element_type=jnp.float32) * scale
        s = s + bias
        m = jnp.max(s, axis=-1, keepdims=True)
        p = jnp.exp(s - m)
        inv = pl.reciprocal(jnp.sum(p, axis=-1, keepdims=True), approx=True)
        outs.append(jnp.dot(p, vh, preferred_element_type=jnp.float32) * inv)
    o_ref[...] = jnp.concatenate(outs, axis=-1).astype(o_ref.dtype)


def attention_core(q, k, v, bias, nhead):
    """q: (B,Sq,E), k/v: (B,Sk,E), bias: (B,Sq,Sk) additive -> (B,Sq,E)."""
    B, Sq, E = q.shape
    Sk = k.shape[1]
    D = E // nhead
    scale = 1.0 / math.sqrt(D)
    return pl.pallas_call(
        functools.partial(_mha_attn_kernel, nhead=nhead, head_dim=D, scale=scale),
        grid=(B,),
        in_specs=[
            pl.BlockSpec((None, Sq, E), lambda b: (b, 0, 0)),
            pl.BlockSpec((None, Sk, E), lambda b: (b, 0, 0)),
            pl.BlockSpec((None, Sk, E), lambda b: (b, 0, 0)),
            pl.BlockSpec((None, Sq, Sk), lambda b: (b, 0, 0)),
        ],
        out_specs=pl.BlockSpec((None, Sq, E), lambda b: (b, 0, 0)),
        out_shape=jax.ShapeDtypeStruct((B, Sq, E), q.dtype),
        compiler_params=pltpu.CompilerParams(dimension_semantics=("parallel",)),
    )(q, k, v, bias)


# ----------------------------------------------------------------------------
# Model building blocks
# ----------------------------------------------------------------------------


def self_attention(x, p, nhead, bias):
    """Fused QKV projection + multi-head attention (output projection is fused
    into the following residual+LayerNorm kernel by the caller)."""
    B, S, E = x.shape
    qkv = linear(x.reshape(B * S, E), p["w_qkv"], p["b_qkv"])      # (B*S, 3E)
    q = qkv[:, :E].reshape(B, S, E)
    k = qkv[:, E:2 * E].reshape(B, S, E)
    v = qkv[:, 2 * E:].reshape(B, S, E)
    return attention_core(q, k, v, bias, nhead)


def cross_attention(x, memory, p, nhead, bias):
    B, St, E = x.shape
    Ss = memory.shape[1]
    q = linear(x.reshape(B * St, E), p["wq"], p["bq"]).reshape(B, St, E)
    kv = linear(memory.reshape(B * Ss, E), p["w_kv"], p["b_kv"])    # (B*Ss, 2E)
    k = kv[:, :E].reshape(B, Ss, E)
    v = kv[:, E:].reshape(B, Ss, E)
    return attention_core(q, k, v, bias, nhead)


def encoder_layer(x, p, nhead, bias):
    # post-norm (norm_first=False, PyTorch default)
    attn = self_attention(x, p["self_attn"], nhead, bias)
    x = proj_add_layernorm(attn, p["self_attn"]["wo"], p["self_attn"]["bo"],
                           x, p["norm1_g"], p["norm1_b"])
    x = ffn_add_layernorm(x, p["w1"], p["b1"], p["w2"], p["b2"],
                          p["norm2_g"], p["norm2_b"])
    return x


def decoder_layer(x, memory, p, nhead, self_bias, cross_bias):
    sa = self_attention(x, p["self_attn"], nhead, self_bias)
    x = proj_add_layernorm(sa, p["self_attn"]["wo"], p["self_attn"]["bo"],
                           x, p["norm1_g"], p["norm1_b"])
    ca = cross_attention(x, memory, p["cross_attn"], nhead, cross_bias)
    x = proj_add_layernorm(ca, p["cross_attn"]["wo"], p["cross_attn"]["bo"],
                           x, p["norm2_g"], p["norm2_b"])
    x = ffn_add_layernorm(x, p["w1"], p["b1"], p["w2"], p["b2"],
                          p["norm3_g"], p["norm3_b"])
    return x


def make_bias(attn_mask, key_padding_mask, B, Sq, Sk):
    """Combine float attn_mask (Sq,Sk) and bool key_padding_mask (B,Sk) into a
    single additive bias (B,Sq,Sk) (head-independent, so no H broadcast).
    -inf entries are clamped to a large finite negative."""
    bias = jnp.zeros((B, Sq, Sk), jnp.float32)
    if attn_mask is not None:
        bias = bias + jnp.maximum(attn_mask.astype(jnp.float32), NEG_BIG)[None, :, :]
    if key_padding_mask is not None:
        bias = bias + jnp.where(key_padding_mask, NEG_BIG, 0.0)[:, None, :]
    return bias


def make_pos_embedding(maxlen, embed_size):
    den = jnp.exp(-jnp.arange(0, embed_size, 2, dtype=jnp.float32)
                  * math.log(10000.0) / embed_size)
    pos = jnp.arange(0, maxlen, dtype=jnp.float32).reshape(maxlen, 1)
    pe = jnp.zeros((maxlen, embed_size), jnp.float32)
    pe = pe.at[:, 0::2].set(jnp.sin(pos * den))
    pe = pe.at[:, 1::2].set(jnp.cos(pos * den))
    return pe


def token_embed(tokens, table, embed_size):
    # TokenEmbedding: embedding lookup * sqrt(embed_size)
    return jnp.take(table, tokens, axis=0) * math.sqrt(embed_size)


def seq2seq_forward(params, cfg, src, trg, src_mask, tgt_mask,
                    src_padding_mask, tgt_padding_mask, memory_key_padding_mask):
    E, H, V = cfg["embed_size"], cfg["nhead"], cfg["vocab_size"]
    B, Ss = src.shape
    St = trg.shape[1]
    pe = params["pos_embedding"]

    # embeddings + positional encoding (dropout = identity in eval)
    src_emb = token_embed(src, params["src_emb"], E) + pe[:Ss][None, :, :]
    tgt_emb = token_embed(trg, params["tgt_emb"], E) + pe[:St][None, :, :]

    enc_bias = make_bias(src_mask, src_padding_mask, B, Ss, Ss)
    dec_self_bias = make_bias(tgt_mask, tgt_padding_mask, B, St, St)
    dec_cross_bias = make_bias(None, memory_key_padding_mask, B, St, Ss)

    # encoder
    x = src_emb
    for p in params["encoder_layers"]:
        x = encoder_layer(x, p, H, enc_bias)
    memory = layernorm(x, params["enc_norm_g"], params["enc_norm_b"])

    # decoder
    y = tgt_emb
    for p in params["decoder_layers"]:
        y = decoder_layer(y, memory, p, H, dec_self_bias, dec_cross_bias)
    y = layernorm(y, params["dec_norm_g"], params["dec_norm_b"])

    # generator (weight padded to a 128-wide lane axis; slice back to V)
    logits = linear(y.reshape(B * St, E), params["gen_w"], params["gen_b"])
    return logits[:, :V].reshape(B, St, V)


# ----------------------------------------------------------------------------
# Deterministic parameter initialization (synthetic; shapes match the module)
# ----------------------------------------------------------------------------


def init_params(key, num_enc, num_dec, E, V, FF, maxlen=64):
    keys = iter(jax.random.split(key, 256))

    def lin(fan_in, fan_out):
        w = jax.random.normal(next(keys), (fan_in, fan_out), jnp.float32) / math.sqrt(fan_in)
        b = jax.random.normal(next(keys), (fan_out,), jnp.float32) * 0.01
        return w, b

    def attn_self_p():
        wq, bq = lin(E, E)
        wk, bk = lin(E, E)
        wv, bv = lin(E, E)
        wo, bo = lin(E, E)
        return dict(w_qkv=jnp.concatenate([wq, wk, wv], axis=1),
                    b_qkv=jnp.concatenate([bq, bk, bv]),
                    wo=wo, bo=bo)

    def attn_cross_p():
        wq, bq = lin(E, E)
        wk, bk = lin(E, E)
        wv, bv = lin(E, E)
        wo, bo = lin(E, E)
        return dict(wq=wq, bq=bq,
                    w_kv=jnp.concatenate([wk, wv], axis=1),
                    b_kv=jnp.concatenate([bk, bv]),
                    wo=wo, bo=bo)

    def ln():
        return jnp.ones((E,), jnp.float32), jnp.zeros((E,), jnp.float32)

    enc_layers = []
    for _ in range(num_enc):
        w1, b1 = lin(E, FF)
        w2, b2 = lin(FF, E)
        n1g, n1b = ln()
        n2g, n2b = ln()
        enc_layers.append(dict(self_attn=attn_self_p(), w1=w1, b1=b1, w2=w2, b2=b2,
                               norm1_g=n1g, norm1_b=n1b, norm2_g=n2g, norm2_b=n2b))

    dec_layers = []
    for _ in range(num_dec):
        w1, b1 = lin(E, FF)
        w2, b2 = lin(FF, E)
        n1g, n1b = ln()
        n2g, n2b = ln()
        n3g, n3b = ln()
        dec_layers.append(dict(self_attn=attn_self_p(), cross_attn=attn_cross_p(),
                               w1=w1, b1=b1, w2=w2, b2=b2,
                               norm1_g=n1g, norm1_b=n1b,
                               norm2_g=n2g, norm2_b=n2b,
                               norm3_g=n3g, norm3_b=n3b))

    src_emb = jax.random.normal(next(keys), (V, E), jnp.float32) * 0.1
    src_emb = src_emb.at[PAD_TOKEN].set(0.0)       # padding_idx row = 0
    tgt_emb = jax.random.normal(next(keys), (V, E), jnp.float32) * 0.1
    tgt_emb = tgt_emb.at[PAD_TOKEN].set(0.0)

    gen_w, gen_b = lin(E, V)
    # pad generator output dim up to a multiple of 128 lanes (unmasked stores);
    # forward slices logits back to V.
    Vp = ((V + 127) // 128) * 128
    gen_w = jnp.pad(gen_w, ((0, 0), (0, Vp - V)))
    gen_b = jnp.pad(gen_b, (0, Vp - V))

    eng, enb = ln()
    dng, dnb = ln()

    return dict(encoder_layers=enc_layers, decoder_layers=dec_layers,
                enc_norm_g=eng, enc_norm_b=enb,
                dec_norm_g=dng, dec_norm_b=dnb,
                src_emb=src_emb, tgt_emb=tgt_emb,
                gen_w=gen_w, gen_b=gen_b,
                pos_embedding=make_pos_embedding(maxlen, E))


# ----------------------------------------------------------------------------
# Main
# ----------------------------------------------------------------------------

if __name__ == "__main__":
    B, S_SRC, S_TGT = 2, 8, 8
    EMBED, NHEAD, FF, VOCAB = 32, 4, 64, 64
    NUM_ENC, NUM_DEC = 2, 2

    cfg = dict(embed_size=EMBED, nhead=NHEAD, vocab_size=VOCAB)

    key = jax.random.PRNGKey(0)
    kp, ks, kt = jax.random.split(key, 3)
    params = init_params(kp, NUM_ENC, NUM_DEC, EMBED, VOCAB, FF)

    # token inputs (int32), with a couple of padded positions
    src = jax.random.randint(ks, (B, S_SRC), 1, VOCAB).astype(jnp.int32)
    trg = jax.random.randint(kt, (B, S_TGT), 1, VOCAB).astype(jnp.int32)
    src = src.at[0, -2:].set(PAD_TOKEN)
    trg = trg.at[0, -1:].set(PAD_TOKEN)

    # masks exactly as the PyTorch training script would build them
    src_mask = jnp.zeros((S_SRC, S_SRC), jnp.float32)
    tgt_mask = jnp.where(jnp.triu(jnp.ones((S_TGT, S_TGT), dtype=bool), k=1),
                         -jnp.inf, 0.0).astype(jnp.float32)
    src_padding_mask = (src == PAD_TOKEN)
    tgt_padding_mask = (trg == PAD_TOKEN)
    memory_key_padding_mask = src_padding_mask

    @jax.jit
    def fwd(params, src, trg, src_mask, tgt_mask, spm, tpm, mpm):
        return seq2seq_forward(params, cfg, src, trg, src_mask, tgt_mask,
                               spm, tpm, mpm)

    logits = fwd(params, src, trg, src_mask, tgt_mask,
                 src_padding_mask, tgt_padding_mask, memory_key_padding_mask)
    logits = jax.block_until_ready(logits)

    assert logits.shape == (B, S_TGT, VOCAB), logits.shape
    assert bool(jnp.all(jnp.isfinite(logits)))
    print("KERNEL_OK")
</pallas_src>

<mosaic_0001>
module attributes {stable_mosaic.version = 11 : i64} {
  func.func @_linear_kernel(%arg0: i32, %arg1: memref<8x32xf32, #tpu.memory_space<vmem>>, %arg2: memref<32x96xf32, #tpu.memory_space<vmem>>, %arg3: memref<1x96xf32, #tpu.memory_space<vmem>>, %arg4: memref<8x96xf32, #tpu.memory_space<vmem>>) attributes {dimension_semantics = [#tpu.dimension_semantics<parallel>], iteration_bounds = array<i64: 2>, scalar_prefetch = 0 : i64, scratch_operands = 0 : i64, tpu.core_type = #tpu.core_type<tc>, window_params = [{transform_indices = @transform_0, window_bounds = array<i64: 8, 32>}, {pipeline_mode = #tpu.pipeline_mode<synchronous>, transform_indices = @transform_1, window_bounds = array<i64: 32, 96>}, {pipeline_mode = #tpu.pipeline_mode<synchronous>, transform_indices = @transform_2, window_bounds = array<i64: 1, 96>}, {transform_indices = @transform_3, window_bounds = array<i64: 8, 96>}]} {
    %c0 = arith.constant 0 : index
    %c0_0 = arith.constant 0 : index
    %0 = vector.load %arg1[%c0, %c0_0] : memref<8x32xf32, #tpu.memory_space<vmem>>, vector<8x32xf32>
    %c0_1 = arith.constant 0 : index
    %c0_2 = arith.constant 0 : index
    %1 = vector.load %arg2[%c0_1, %c0_2] : memref<32x96xf32, #tpu.memory_space<vmem>>, vector<32x96xf32>
    %cst = arith.constant dense<0.000000e+00> : vector<8x96xf32>
    %2 = tpu.matmul %0, %1, %cst {dimension_numbers = #tpu.dot_dimension_numbers<[1], [0], [0], [1], [0, 0, 1, 1], [], []>} : vector<8x32xf32>, vector<32x96xf32>, vector<8x96xf32> -> vector<8x96xf32>
    %c0_3 = arith.constant 0 : index
    %c0_4 = arith.constant 0 : index
    %3 = vector.load %arg3[%c0_3, %c0_4] : memref<1x96xf32, #tpu.memory_space<vmem>>, vector<1x96xf32>
    %4 = vector.broadcast %3 : vector<1x96xf32> to vector<8x96xf32>
    %5 = arith.addf %2, %4 : vector<8x96xf32>
    %c0_5 = arith.constant 0 : index
    %c0_6 = arith.constant 0 : index
    %6 = vector.load %arg4[%c0_5, %c0_6] : memref<8x96xf32, #tpu.memory_space<vmem>>, vector<8x96xf32>
    tpu.vector_store %arg4[%c0_5, %c0_6], %5 {strides = array<i32>} : memref<8x96xf32, #tpu.memory_space<vmem>>, vector<8x96xf32>,
    return
  }
  func.func @transform_0(%arg0: i32) -> (i32, i32) {
    %c0_i32 = arith.constant 0 : i32
    %c0_i32_0 = arith.constant 0 : i32
    return %arg0, %c0_i32 : i32, i32
  }
  func.func @transform_1(%arg0: i32) -> (i32, i32) {
    %c0_i32 = arith.constant 0 : i32
    %c0_i32_0 = arith.constant 0 : i32
    %c0_i32_1 = arith.constant 0 : i32
    return %c0_i32, %c0_i32_0 : i32, i32
  }
  func.func @transform_2(%arg0: i32) -> (i32, i32) {
    %c0_i32 = arith.constant 0 : i32
    %c0_i32_0 = arith.constant 0 : i32
    %c0_i32_1 = arith.constant 0 : i32
    return %c0_i32, %c0_i32_0 : i32, i32
  }
  func.func @transform_3(%arg0: i32) -> (i32, i32) {
    %c0_i32 = arith.constant 0 : i32
    %c0_i32_0 = arith.constant 0 : i32
    return %arg0, %c0_i32 : i32, i32
  }
}

module attributes {stable_mosaic.version = 11 : i64} {
  func.func @_proj_add_ln_kernel(%arg0: i32, %arg1: memref<8x32xf32, #tpu.memory_space<vmem>>, %arg2: memref<32x32xf32, #tpu.memory_space<vmem>>, %arg3: memref<1x32xf32, #tpu.memory_space<vmem>>, %arg4: memref<8x32xf32, #tpu.memory_space<vmem>>, %arg5: memref<1x32xf32, #tpu.memory_space<vmem>>, %arg6: memref<1x32xf32, #tpu.memory_space<vmem>>, %arg7: memref<8x32xf32, #tpu.memory_space<vmem>>) attributes {dimension_semantics = [#tpu.dimension_semantics<parallel>], iteration_bounds = array<i64: 2>, scalar_prefetch = 0 : i64, scratch_operands = 0 : i64, tpu.core_type = #tpu.core_type<tc>, window_params = [{transform_indices = @transform_0, window_bounds = array<i64: 8, 32>}, {pipeline_mode = #tpu.pipeline_mode<synchronous>, transform_indices = @transform_1, window_bounds = array<i64: 32, 32>}, {pipeline_mode = #tpu.pipeline_mode<synchronous>, transform_indices = @transform_2, window_bounds = array<i64: 1, 32>}, {transform_indices = @transform_3, window_bounds = array<i64: 8, 32>}, {pipeline_mode = #tpu.pipeline_mode<synchronous>, transform_indices = @transform_4, window_bounds = array<i64: 1, 32>}, {pipeline_mode = #tpu.pipeline_mode<synchronous>, transform_indices = @transform_5, window_bounds = array<i64: 1, 32>}, {transform_indices = @transform_6, window_bounds = array<i64: 8, 32>}]} {
    %c0 = arith.constant 0 : index
    %c0_0 = arith.constant 0 : index
    %0 = vector.load %arg1[%c0, %c0_0] : memref<8x32xf32, #tpu.memory_space<vmem>>, vector<8x32xf32>
    %c0_1 = arith.constant 0 : index
    %c0_2 = arith.constant 0 : index
    %1 = vector.load %arg2[%c0_1, %c0_2] : memref<32x32xf32, #tpu.memory_space<vmem>>, vector<32x32xf32>
    %cst = arith.constant dense<0.000000e+00> : vector<8x32xf32>
    %2 = tpu.matmul %0, %1, %cst {dimension_numbers = #tpu.dot_dimension_numbers<[1], [0], [0], [1], [0, 0, 1, 1], [], []>} : vector<8x32xf32>, vector<32x32xf32>, vector<8x32xf32> -> vector<8x32xf32>
    %c0_3 = arith.constant 0 : index
    %c0_4 = arith.constant 0 : index
    %3 = vector.load %arg3[%c0_3, %c0_4] : memref<1x32xf32, #tpu.memory_space<vmem>>, vector<1x32xf32>
    %4 = vector.broadcast %3 : vector<1x32xf32> to vector<8x32xf32>
    %5 = arith.addf %2, %4 : vector<8x32xf32>
    %c0_5 = arith.constant 0 : index
    %c0_6 = arith.constant 0 : index
    %6 = vector.load %arg4[%c0_5, %c0_6] : memref<8x32xf32, #tpu.memory_space<vmem>>, vector<8x32xf32>
    %7 = arith.addf %5, %6 : vector<8x32xf32>
    %c0_7 = arith.constant 0 : index
    %c0_8 = arith.constant 0 : index
    %8 = vector.load %arg5[%c0_7, %c0_8] : memref<1x32xf32, #tpu.memory_space<vmem>>, vector<1x32xf32>
    %c0_9 = arith.constant 0 : index
    %c0_10 = arith.constant 0 : index
    %9 = vector.load %arg6[%c0_9, %c0_10] : memref<1x32xf32, #tpu.memory_space<vmem>>, vector<1x32xf32>
    %cst_11 = arith.constant dense<0.000000e+00> : vector<8xf32>
    %10 = vector.multi_reduction <add>, %7, %cst_11 [1] : vector<8x32xf32> to vector<8xf32>
    %11 = vector.shape_cast %10 : vector<8xf32> to vector<8x1xf32>
    %cst_12 = arith.constant 3.200000e+01 : f32
    %12 = vector.broadcast %cst_12 : f32 to vector<8x1xf32>
    %13 = arith.divf %11, %12 : vector<8x1xf32>
    %14 = vector.broadcast %13 : vector<8x1xf32> to vector<8x32xf32>
    %15 = arith.subf %7, %14 : vector<8x32xf32>
    %16 = arith.mulf %15, %15 : vector<8x32xf32>
    %cst_13 = arith.constant dense<0.000000e+00> : vector<8xf32>
    %17 = vector.multi_reduction <add>, %16, %cst_13 [1] : vector<8x32xf32> to vector<8xf32>
    %18 = vector.shape_cast %17 : vector<8xf32> to vector<8x1xf32>
    %cst_14 = arith.constant 3.200000e+01 : f32
    %19 = vector.broadcast %cst_14 : f32 to vector<8x1xf32>
    %20 = arith.divf %18, %19 : vector<8x1xf32>
    %21 = vector.broadcast %13 : vector<8x1xf32> to vector<8x32xf32>
    %22 = arith.subf %7, %21 : vector<8x32xf32>
    %cst_15 = arith.constant 9.99999974E-6 : f32
    %23 = vector.broadcast %cst_15 : f32 to vector<8x1xf32>
    %24 = arith.addf %20, %23 : vector<8x1xf32>
    %25 = math.rsqrt %24 : vector<8x1xf32>
    %26 = vector.broadcast %25 : vector<8x1xf32> to vector<8x32xf32>
    %27 = arith.mulf %22, %26 : vector<8x32xf32>
    %28 = vector.broadcast %8 : vector<1x32xf32> to vector<8x32xf32>
    %29 = arith.mulf %27, %28 : vector<8x32xf32>
    %30 = vector.broadcast %9 : vector<1x32xf32> to vector<8x32xf32>
    %31 = arith.addf %29, %30 : vector<8x32xf32>
    %c0_16 = arith.constant 0 : index
    %c0_17 = arith.constant 0 : index
    %32 = vector.load %arg7[%c0_16, %c0_17] : memref<8x32xf32, #tpu.memory_space<vmem>>, vector<8x32xf32>
    tpu.vector_store %arg7[%c0_16, %c0_17], %31 {strides = array<i32>} : memref<8x32xf32, #tpu.memory_space<vmem>>, vector<8x32xf32>,
    return
  }
  func.func @transform_0(%arg0: i32) -> (i32, i32) {
    %c0_i32 = arith.constant 0 : i32
    %c0_i32_0 = arith.constant 0 : i32
    return %arg0, %c0_i32 : i32, i32
  }
  func.func @transform_1(%arg0: i32) -> (i32, i32) {
    %c0_i32 = arith.constant 0 : i32
    %c0_i32_0 = arith.constant 0 : i32
    %c0_i32_1 = arith.constant 0 : i32
    return %c0_i32, %c0_i32_0 : i32, i32
  }
  func.func @transform_2(%arg0: i32) -> (i32, i32) {
    %c0_i32 = arith.constant 0 : i32
    %c0_i32_0 = arith.constant 0 : i32
    %c0_i32_1 = arith.constant 0 : i32
    return %c0_i32, %c0_i32_0 : i32, i32
  }
  func.func @transform_3(%arg0: i32) -> (i32, i32) {
    %c0_i32 = arith.constant 0 : i32
    %c0_i32_0 = arith.constant 0 : i32
    return %arg0, %c0_i32 : i32, i32
  }
  func.func @transform_4(%arg0: i32) -> (i32, i32) {
    %c0_i32 = arith.constant 0 : i32
    %c0_i32_0 = arith.constant 0 : i32
    %c0_i32_1 = arith.constant 0 : i32
    return %c0_i32, %c0_i32_0 : i32, i32
  }
  func.func @transform_5(%arg0: i32) -> (i32, i32) {
    %c0_i32 = arith.constant 0 : i32
    %c0_i32_0 = arith.constant 0 : i32
    %c0_i32_1 = arith.constant 0 : i32
    return %c0_i32, %c0_i32_0 : i32, i32
  }
  func.func @transform_6(%arg0: i32) -> (i32, i32) {
    %c0_i32 = arith.constant 0 : i32
    %c0_i32_0 = arith.constant 0 : i32
    return %arg0, %c0_i32 : i32, i32
  }
}

module attributes {stable_mosaic.version = 11 : i64} {
  func.func @_mha_attn_kernel(%arg0: i32, %arg1: memref<1x8x32xf32, #tpu.memory_space<vmem>>, %arg2: memref<1x8x32xf32, #tpu.memory_space<vmem>>, %arg3: memref<1x8x32xf32, #tpu.memory_space<vmem>>, %arg4: memref<1x8x8xf32, #tpu.memory_space<vmem>>, %arg5: memref<1x8x32xf32, #tpu.memory_space<vmem>>) attributes {dimension_semantics = [#tpu.dimension_semantics<parallel>], iteration_bounds = array<i64: 2>, scalar_prefetch = 0 : i64, scratch_operands = 0 : i64, tpu.core_type = #tpu.core_type<tc>, window_params = [{transform_indices = @transform_0, window_bounds = array<i64: 1, 8, 32>}, {transform_indices = @transform_1, window_bounds = array<i64: 1, 8, 32>}, {transform_indices = @transform_2, window_bounds = array<i64: 1, 8, 32>}, {transform_indices = @transform_3, window_bounds = array<i64: 1, 8, 8>}, {transform_indices = @transform_4, window_bounds = array<i64: 1, 8, 32>}]} {
    %c0 = arith.constant 0 : index
    %c0_0 = arith.constant 0 : index
    %c0_1 = arith.constant 0 : index
    %0 = vector.load %arg1[%c0, %c0_0, %c0_1] : memref<1x8x32xf32, #tpu.memory_space<vmem>>, vector<1x8x32xf32>
    %1 = vector.shape_cast %0 : vector<1x8x32xf32> to vector<8x32xf32>
    %c0_2 = arith.constant 0 : index
    %c0_3 = arith.constant 0 : index
    %c0_4 = arith.constant 0 : index
    %2 = vector.load %arg2[%c0_2, %c0_3, %c0_4] : memref<1x8x32xf32, #tpu.memory_space<vmem>>, vector<1x8x32xf32>
    %3 = vector.shape_cast %2 : vector<1x8x32xf32> to vector<8x32xf32>
    %c0_5 = arith.constant 0 : index
    %c0_6 = arith.constant 0 : index
    %c0_7 = arith.constant 0 : index
    %4 = vector.load %arg3[%c0_5, %c0_6, %c0_7] : memref<1x8x32xf32, #tpu.memory_space<vmem>>, vector<1x8x32xf32>
    %5 = vector.shape_cast %4 : vector<1x8x32xf32> to vector<8x32xf32>
    %c0_8 = arith.constant 0 : index
    %c0_9 = arith.constant 0 : index
    %c0_10 = arith.constant 0 : index
    %6 = vector.load %arg4[%c0_8, %c0_9, %c0_10] : memref<1x8x8xf32, #tpu.memory_space<vmem>>, vector<1x8x8xf32>
    %7 = vector.shape_cast %6 : vector<1x8x8xf32> to vector<8x8xf32>
    %8 = vector.extract_strided_slice %1 {offsets = [0, 0], sizes = [8, 8], strides = [1, 1]} : vector<8x32xf32> to vector<8x8xf32>
    %9 = vector.extract_strided_slice %3 {offsets = [0, 0], sizes = [8, 8], strides = [1, 1]} : vector<8x32xf32> to vector<8x8xf32>
    %10 = vector.extract_strided_slice %5 {offsets = [0, 0], sizes = [8, 8], strides = [1, 1]} : vector<8x32xf32> to vector<8x8xf32>
    %cst = arith.constant dense<0.000000e+00> : vector<8x8xf32>
    %11 = tpu.matmul %8, %9, %cst {dimension_numbers = #tpu.dot_dimension_numbers<[1], [1], [0], [0], [0, 0, 1, 0], [], []>} : vector<8x8xf32>, vector<8x8xf32>, vector<8x8xf32> -> vector<8x8xf32>
    %cst_11 = arith.constant 0.353553385 : f32
    %12 = vector.broadcast %cst_11 : f32 to vector<8x8xf32>
    %13 = arith.mulf %11, %12 : vector<8x8xf32>
    %14 = arith.addf %13, %7 : vector<8x8xf32>
    %cst_12 = arith.constant dense<0xFF800000> : vector<8xf32>
    %15 = vector.multi_reduction <maximumf>, %14, %cst_12 [1] : vector<8x8xf32> to vector<8xf32>
    %16 = vector.shape_cast %15 : vector<8xf32> to vector<8x1xf32>
    %17 = vector.broadcast %16 : vector<8x1xf32> to vector<8x8xf32>
    %18 = arith.subf %14, %17 : vector<8x8xf32>
    %19 = math.exp %18 : vector<8x8xf32>
    %cst_13 = arith.constant dense<0.000000e+00> : vector<8xf32>
    %20 = vector.multi_reduction <add>, %19, %cst_13 [1] : vector<8x8xf32> to vector<8xf32>
    %21 = vector.shape_cast %20 : vector<8xf32> to vector<8x1xf32>
    %22 = tpu.reciprocal %21 {approx = true} : vector<8x1xf32> -> vector<8x1xf32>
    %cst_14 = arith.constant dense<0.000000e+00> : vector<8x8xf32>
    %23 = tpu.matmul %19, %10, %cst_14 {dimension_numbers = #tpu.dot_dimension_numbers<[1], [0], [0], [1], [0, 0, 1, 1], [], []>} : vector<8x8xf32>, vector<8x8xf32>, vector<8x8xf32> -> vector<8x8xf32>
    %24 = vector.broadcast %22 : vector<8x1xf32> to vector<8x8xf32>
    %25 = arith.mulf %23, %24 : vector<8x8xf32>
    %26 = vector.extract_strided_slice %1 {offsets = [0, 8], sizes = [8, 8], strides = [1, 1]} : vector<8x32xf32> to vector<8x8xf32>
    %27 = vector.extract_strided_slice %3 {offsets = [0, 8], sizes = [8, 8], strides = [1, 1]} : vector<8x32xf32> to vector<8x8xf32>
    %28 = vector.extract_strided_slice %5 {offsets = [0, 8], sizes = [8, 8], strides = [1, 1]} : vector<8x32xf32> to vector<8x8xf32>
    %cst_15 = arith.constant dense<0.000000e+00> : vector<8x8xf32>
    %29 = tpu.matmul %26, %27, %cst_15 {dimension_numbers = #tpu.dot_dimension_numbers<[1], [1], [0], [0], [0, 0, 1, 0], [], []>} : vector<8x8xf32>, vector<8x8xf32>, vector<8x8xf32> -> vector<8x8xf32>
    %cst_16 = arith.constant 0.353553385 : f32
    %30 = vector.broadcast %cst_16 : f32 to vector<8x8xf32>
    %31 = arith.mulf %29, %30 : vector<8x8xf32>
    %32 = arith.addf %31, %7 : vector<8x8xf32>
    %cst_17 = arith.constant dense<0xFF800000> : vector<8xf32>
    %33 = vector.multi_reduction <maximumf>, %32, %cst_17 [1] : vector<8x8xf32> to vector<8xf32>
    %34 = vector.shape_cast %33 : vector<8xf32> to vector<8x1xf32>
    %35 = vector.broadcast %34 : vector<8x1xf32> to vector<8x8xf32>
    %36 = arith.subf %32, %35 : vector<8x8xf32>
    %37 = math.exp %36 : vector<8x8xf32>
    %cst_18 = arith.constant dense<0.000000e+00> : vector<8xf32>
    %38 = vector.multi_reduction <add>, %37, %cst_18 [1] : vector<8x8xf32> to vector<8xf32>
    %39 = vector.shape_cast %38 : vector<8xf32> to vector<8x1xf32>
    %40 = tpu.reciprocal %39 {approx = true} : vector<8x1xf32> -> vector<8x1xf32>
    %cst_19 = arith.constant dense<0.000000e+00> : vector<8x8xf32>
    %41 = tpu.matmul %37, %28, %cst_19 {dimension_numbers = #tpu.dot_dimension_numbers<[1], [0], [0], [1], [0, 0, 1, 1], [], []>} : vector<8x8xf32>, vector<8x8xf32>, vector<8x8xf32> -> vector<8x8xf32>
    %42 = vector.broadcast %40 : vector<8x1xf32> to vector<8x8xf32>
    %43 = arith.mulf %41, %42 : vector<8x8xf32>
    %44 = vector.extract_strided_slice %1 {offsets = [0, 16], sizes = [8, 8], strides = [1, 1]} : vector<8x32xf32> to vector<8x8xf32>
    %45 = vector.extract_strided_slice %3 {offsets = [0, 16], sizes = [8, 8], strides = [1, 1]} : vector<8x32xf32> to vector<8x8xf32>
    %46 = vector.extract_strided_slice %5 {offsets = [0, 16], sizes = [8, 8], strides = [1, 1]} : vector<8x32xf32> to vector<8x8xf32>
    %cst_20 = arith.constant dense<0.000000e+00> : vector<8x8xf32>
    %47 = tpu.matmul %44, %45, %cst_20 {dimension_numbers = #tpu.dot_dimension_numbers<[1], [1], [0], [0], [0, 0, 1, 0], [], []>} : vector<8x8xf32>, vector<8x8xf32>, vector<8x8xf32> -> vector<8x8xf32>
    %cst_21 = arith.constant 0.353553385 : f32
    %48 = vector.broadcast %cst_21 : f32 to vector<8x8xf32>
    %49 = arith.mulf %47, %48 : vector<8x8xf32>
    %50 = arith.addf %49, %7 : vector<8x8xf32>
    %cst_22 = arith.constant dense<0xFF800000> : vector<8xf32>
    %51 = vector.multi_reduction <maximumf>, %50, %cst_22 [1] : vector<8x8xf32> to vector<8xf32>
    %52 = vector.shape_cast %51 : vector<8xf32> to vector<8x1xf32>
    %53 = vector.broadcast %52 : vector<8x1xf32> to vector<8x8xf32>
    %54 = arith.subf %50, %53 : vector<8x8xf32>
    %55 = math.exp %54 : vector<8x8xf32>
    %cst_23 = arith.constant dense<0.000000e+00> : vector<8xf32>
    %56 = vector.multi_reduction <add>, %55, %cst_23 [1] : vector<8x8xf32> to vector<8xf32>
    %57 = vector.shape_cast %56 : vector<8xf32> to vector<8x1xf32>
    %58 = tpu.reciprocal %57 {approx = true} : vector<8x1xf32> -> vector<8x1xf32>
    %cst_24 = arith.constant dense<0.000000e+00> : vector<8x8xf32>
    %59 = tpu.matmul %55, %46, %cst_24 {dimension_numbers = #tpu.dot_dimension_numbers<[1], [0], [0], [1], [0, 0, 1, 1], [], []>} : vector<8x8xf32>, vector<8x8xf32>, vector<8x8xf32> -> vector<8x8xf32>
    %60 = vector.broadcast %58 : vector<8x1xf32> to vector<8x8xf32>
    %61 = arith.mulf %59, %60 : vector<8x8xf32>
    %62 = vector.extract_strided_slice %1 {offsets = [0, 24], sizes = [8, 8], strides = [1, 1]} : vector<8x32xf32> to vector<8x8xf32>
    %63 = vector.extract_strided_slice %3 {offsets = [0, 24], sizes = [8, 8], strides = [1, 1]} : vector<8x32xf32> to vector<8x8xf32>
    %64 = vector.extract_strided_slice %5 {offsets = [0, 24], sizes = [8, 8], strides = [1, 1]} : vector<8x32xf32> to vector<8x8xf32>
    %cst_25 = arith.constant dense<0.000000e+00> : vector<8x8xf32>
    %65 = tpu.matmul %62, %63, %cst_25 {dimension_numbers = #tpu.dot_dimension_numbers<[1], [1], [0], [0], [0, 0, 1, 0], [], []>} : vector<8x8xf32>, vector<8x8xf32>, vector<8x8xf32> -> vector<8x8xf32>
    %cst_26 = arith.constant 0.353553385 : f32
    %66 = vector.broadcast %cst_26 : f32 to vector<8x8xf32>
    %67 = arith.mulf %65, %66 : vector<8x8xf32>
    %68 = arith.addf %67, %7 : vector<8x8xf32>
    %cst_27 = arith.constant dense<0xFF800000> : vector<8xf32>
    %69 = vector.multi_reduction <maximumf>, %68, %cst_27 [1] : vector<8x8xf32> to vector<8xf32>
    %70 = vector.shape_cast %69 : vector<8xf32> to vector<8x1xf32>
    %71 = vector.broadcast %70 : vector<8x1xf32> to vector<8x8xf32>
    %72 = arith.subf %68, %71 : vector<8x8xf32>
    %73 = math.exp %72 : vector<8x8xf32>
    %cst_28 = arith.constant dense<0.000000e+00> : vector<8xf32>
    %74 = vector.multi_reduction <add>, %73, %cst_28 [1] : vector<8x8xf32> to vector<8xf32>
    %75 = vector.shape_cast %74 : vector<8xf32> to vector<8x1xf32>
    %76 = tpu.reciprocal %75 {approx = true} : vector<8x1xf32> -> vector<8x1xf32>
    %cst_29 = arith.constant dense<0.000000e+00> : vector<8x8xf32>
    %77 = tpu.matmul %73, %64, %cst_29 {dimension_numbers = #tpu.dot_dimension_numbers<[1], [0], [0], [1], [0, 0, 1, 1], [], []>} : vector<8x8xf32>, vector<8x8xf32>, vector<8x8xf32> -> vector<8x8xf32>
    %78 = vector.broadcast %76 : vector<8x1xf32> to vector<8x8xf32>
    %79 = arith.mulf %77, %78 : vector<8x8xf32>
    %80 = tpu.concatenate %25, %43, %61, %79 in 1 : vector<8x8xf32>, vector<8x8xf32>, vector<8x8xf32>, vector<8x8xf32> -> vector<8x32xf32>
    %c0_30 = arith.constant 0 : index
    %c0_31 = arith.constant 0 : index
    %c0_32 = arith.constant 0 : index
    %81 = vector.load %arg5[%c0_30, %c0_31, %c0_32] : memref<1x8x32xf32, #tpu.memory_space<vmem>>, vector<1x8x32xf32>
    %82 = vector.shape_cast %81 : vector<1x8x32xf32> to vector<8x32xf32>
    %83 = vector.shape_cast %80 : vector<8x32xf32> to vector<1x8x32xf32>
    tpu.vector_store %arg5[%c0_30, %c0_31, %c0_32], %83 {strides = array<i32>} : memref<1x8x32xf32, #tpu.memory_space<vmem>>, vector<1x8x32xf32>,
    return
  }
  func.func @transform_0(%arg0: i32) -> (i32, i32, i32) {
    %c0_i32 = arith.constant 0 : i32
    %c0_i32_0 = arith.constant 0 : i32
    %c0_i32_1 = arith.constant 0 : i32
    return %arg0, %c0_i32, %c0_i32_0 : i32, i32, i32
  }
  func.func @transform_1(%arg0: i32) -> (i32, i32, i32) {
    %c0_i32 = arith.constant 0 : i32
    %c0_i32_0 = arith.constant 0 : i32
    %c0_i32_1 = arith.constant 0 : i32
    return %arg0, %c0_i32, %c0_i32_0 : i32, i32, i32
  }
  func.func @transform_2(%arg0: i32) -> (i32, i32, i32) {
    %c0_i32 = arith.constant 0 : i32
    %c0_i32_0 = arith.constant 0 : i32
    %c0_i32_1 = arith.constant 0 : i32
    return %arg0, %c0_i32, %c0_i32_0 : i32, i32, i32
  }
  func.func @transform_3(%arg0: i32) -> (i32, i32, i32) {
    %c0_i32 = arith.constant 0 : i32
    %c0_i32_0 = arith.constant 0 : i32
    %c0_i32_1 = arith.constant 0 : i32
    return %arg0, %c0_i32, %c0_i32_0 : i32, i32, i32
  }
  func.func @transform_4(%arg0: i32) -> (i32, i32, i32) {
    %c0_i32 = arith.constant 0 : i32
    %c0_i32_0 = arith.constant 0 : i32
    %c0_i32_1 = arith.constant 0 : i32
    return %arg0, %c0_i32, %c0_i32_0 : i32, i32, i32
  }
}

module attributes {stable_mosaic.version = 11 : i64} {
  func.func @_ffn_add_ln_kernel(%arg0: i32, %arg1: memref<8x32xf32, #tpu.memory_space<vmem>>, %arg2: memref<32x64xf32, #tpu.memory_space<vmem>>, %arg3: memref<1x64xf32, #tpu.memory_space<vmem>>, %arg4: memref<64x32xf32, #tpu.memory_space<vmem>>, %arg5: memref<1x32xf32, #tpu.memory_space<vmem>>, %arg6: memref<1x32xf32, #tpu.memory_space<vmem>>, %arg7: memref<1x32xf32, #tpu.memory_space<vmem>>, %arg8: memref<8x32xf32, #tpu.memory_space<vmem>>) attributes {dimension_semantics = [#tpu.dimension_semantics<parallel>], iteration_bounds = array<i64: 2>, scalar_prefetch = 0 : i64, scratch_operands = 0 : i64, tpu.core_type = #tpu.core_type<tc>, window_params = [{transform_indices = @transform_0, window_bounds = array<i64: 8, 32>}, {pipeline_mode = #tpu.pipeline_mode<synchronous>, transform_indices = @transform_1, window_bounds = array<i64: 32, 64>}, {pipeline_mode = #tpu.pipeline_mode<synchronous>, transform_indices = @transform_2, window_bounds = array<i64: 1, 64>}, {pipeline_mode = #tpu.pipeline_mode<synchronous>, transform_indices = @transform_3, window_bounds = array<i64: 64, 32>}, {pipeline_mode = #tpu.pipeline_mode<synchronous>, transform_indices = @transform_4, window_bounds = array<i64: 1, 32>}, {pipeline_mode = #tpu.pipeline_mode<synchronous>, transform_indices = @transform_5, window_bounds = array<i64: 1, 32>}, {pipeline_mode = #tpu.pipeline_mode<synchronous>, transform_indices = @transform_6, window_bounds = array<i64: 1, 32>}, {transform_indices = @transform_7, window_bounds = array<i64: 8, 32>}]} {
    %c0 = arith.constant 0 : index
    %c0_0 = arith.constant 0 : index
    %0 = vector.load %arg1[%c0, %c0_0] : memref<8x32xf32, #tpu.memory_space<vmem>>, vector<8x32xf32>
    %c0_1 = arith.constant 0 : index
    %c0_2 = arith.constant 0 : index
    %1 = vector.load %arg2[%c0_1, %c0_2] : memref<32x64xf32, #tpu.memory_space<vmem>>, vector<32x64xf32>
    %cst = arith.constant dense<0.000000e+00> : vector<8x64xf32>
    %2 = tpu.matmul %0, %1, %cst {dimension_numbers = #tpu.dot_dimension_numbers<[1], [0], [0], [1], [0, 0, 1, 1], [], []>} : vector<8x32xf32>, vector<32x64xf32>, vector<8x64xf32> -> vector<8x64xf32>
    %c0_3 = arith.constant 0 : index
    %c0_4 = arith.constant 0 : index
    %3 = vector.load %arg3[%c0_3, %c0_4] : memref<1x64xf32, #tpu.memory_space<vmem>>, vector<1x64xf32>
    %4 = vector.broadcast %3 : vector<1x64xf32> to vector<8x64xf32>
    %5 = arith.addf %2, %4 : vector<8x64xf32>
    %cst_5 = arith.constant 0.000000e+00 : f32
    %6 = vector.broadcast %cst_5 : f32 to vector<8x64xf32>
    %7 = arith.maximumf %5, %6 : vector<8x64xf32>
    %c0_6 = arith.constant 0 : index
    %c0_7 = arith.constant 0 : index
    %8 = vector.load %arg4[%c0_6, %c0_7] : memref<64x32xf32, #tpu.memory_space<vmem>>, vector<64x32xf32>
    %cst_8 = arith.constant dense<0.000000e+00> : vector<8x32xf32>
    %9 = tpu.matmul %7, %8, %cst_8 {dimension_numbers = #tpu.dot_dimension_numbers<[1], [0], [0], [1], [0, 0, 1, 1], [], []>} : vector<8x64xf32>, vector<64x32xf32>, vector<8x32xf32> -> vector<8x32xf32>
    %c0_9 = arith.constant 0 : index
    %c0_10 = arith.constant 0 : index
    %10 = vector.load %arg5[%c0_9, %c0_10] : memref<1x32xf32, #tpu.memory_space<vmem>>, vector<1x32xf32>
    %11 = vector.broadcast %10 : vector<1x32xf32> to vector<8x32xf32>
    %12 = arith.addf %9, %11 : vector<8x32xf32>
    %13 = arith.addf %12, %0 : vector<8x32xf32>
    %c0_11 = arith.constant 0 : index
    %c0_12 = arith.constant 0 : index
    %14 = vector.load %arg6[%c0_11, %c0_12] : memref<1x32xf32, #tpu.memory_space<vmem>>, vector<1x32xf32>
    %c0_13 = arith.constant 0 : index
    %c0_14 = arith.constant 0 : index
    %15 = vector.load %arg7[%c0_13, %c0_14] : memref<1x32xf32, #tpu.memory_space<vmem>>, vector<1x32xf32>
    %cst_15 = arith.constant dense<0.000000e+00> : vector<8xf32>
    %16 = vector.multi_reduction <add>, %13, %cst_15 [1] : vector<8x32xf32> to vector<8xf32>
    %17 = vector.shape_cast %16 : vector<8xf32> to vector<8x1xf32>
    %cst_16 = arith.constant 3.200000e+01 : f32
    %18 = vector.broadcast %cst_16 : f32 to vector<8x1xf32>
    %19 = arith.divf %17, %18 : vector<8x1xf32>
    %20 = vector.broadcast %19 : vector<8x1xf32> to vector<8x32xf32>
    %21 = arith.subf %13, %20 : vector<8x32xf32>
    %22 = arith.mulf %21, %21 : vector<8x32xf32>
    %cst_17 = arith.constant dense<0.000000e+00> : vector<8xf32>
    %23 = vector.multi_reduction <add>, %22, %cst_17 [1] : vector<8x32xf32> to vector<8xf32>
    %24 = vector.shape_cast %23 : vector<8xf32> to vector<8x1xf32>
    %cst_18 = arith.constant 3.200000e+01 : f32
    %25 = vector.broadcast %cst_18 : f32 to vector<8x1xf32>
    %26 = arith.divf %24, %25 : vector<8x1xf32>
    %27 = vector.broadcast %19 : vector<8x1xf32> to vector<8x32xf32>
    %28 = arith.subf %13, %27 : vector<8x32xf32>
    %cst_19 = arith.constant 9.99999974E-6 : f32
    %29 = vector.broadcast %cst_19 : f32 to vector<8x1xf32>
    %30 = arith.addf %26, %29 : vector<8x1xf32>
    %31 = math.rsqrt %30 : vector<8x1xf32>
    %32 = vector.broadcast %31 : vector<8x1xf32> to vector<8x32xf32>
    %33 = arith.mulf %28, %32 : vector<8x32xf32>
    %34 = vector.broadcast %14 : vector<1x32xf32> to vector<8x32xf32>
    %35 = arith.mulf %33, %34 : vector<8x32xf32>
    %36 = vector.broadcast %15 : vector<1x32xf32> to vector<8x32xf32>
    %37 = arith.addf %35, %36 : vector<8x32xf32>
    %c0_20 = arith.constant 0 : index
    %c0_21 = arith.constant 0 : index
    %38 = vector.load %arg8[%c0_20, %c0_21] : memref<8x32xf32, #tpu.memory_space<vmem>>, vector<8x32xf32>
    tpu.vector_store %arg8[%c0_20, %c0_21], %37 {strides = array<i32>} : memref<8x32xf32, #tpu.memory_space<vmem>>, vector<8x32xf32>,
    return
  }
  func.func @transform_0(%arg0: i32) -> (i32, i32) {
    %c0_i32 = arith.constant 0 : i32
    %c0_i32_0 = arith.constant 0 : i32
    return %arg0, %c0_i32 : i32, i32
  }
  func.func @transform_1(%arg0: i32) -> (i32, i32) {
    %c0_i32 = arith.constant 0 : i32
    %c0_i32_0 = arith.constant 0 : i32
    %c0_i32_1 = arith.constant 0 : i32
    return %c0_i32, %c0_i32_0 : i32, i32
  }
  func.func @transform_2(%arg0: i32) -> (i32, i32) {
    %c0_i32 = arith.constant 0 : i32
    %c0_i32_0 = arith.constant 0 : i32
    %c0_i32_1 = arith.constant 0 : i32
    return %c0_i32, %c0_i32_0 : i32, i32
  }
  func.func @transform_3(%arg0: i32) -> (i32, i32) {
    %c0_i32 = arith.constant 0 : i32
    %c0_i32_0 = arith.constant 0 : i32
    %c0_i32_1 = arith.constant 0 : i32
    return %c0_i32, %c0_i32_0 : i32, i32
  }
  func.func @transform_4(%arg0: i32) -> (i32, i32) {
    %c0_i32 = arith.constant 0 : i32
    %c0_i32_0 = arith.constant 0 : i32
    %c0_i32_1 = arith.constant 0 : i32
    return %c0_i32, %c0_i32_0 : i32, i32
  }
  func.func @transform_5(%arg0: i32) -> (i32, i32) {
    %c0_i32 = arith.constant 0 : i32
    %c0_i32_0 = arith.constant 0 : i32
    %c0_i32_1 = arith.constant 0 : i32
    return %c0_i32, %c0_i32_0 : i32, i32
  }
  func.func @transform_6(%arg0: i32) -> (i32, i32) {
    %c0_i32 = arith.constant 0 : i32
    %c0_i32_0 = arith.constant 0 : i32
    %c0_i32_1 = arith.constant 0 : i32
    return %c0_i32, %c0_i32_0 : i32, i32
  }
  func.func @transform_7(%arg0: i32) -> (i32, i32) {
    %c0_i32 = arith.constant 0 : i32
    %c0_i32_0 = arith.constant 0 : i32
    return %arg0, %c0_i32 : i32, i32
  }
}

module attributes {stable_mosaic.version = 11 : i64} {
  func.func @_linear_kernel(%arg0: i32, %arg1: memref<8x32xf32, #tpu.memory_space<vmem>>, %arg2: memref<32x64xf32, #tpu.memory_space<vmem>>, %arg3: memref<1x64xf32, #tpu.memory_space<vmem>>, %arg4: memref<8x64xf32, #tpu.memory_space<vmem>>) attributes {dimension_semantics = [#tpu.dimension_semantics<parallel>], iteration_bounds = array<i64: 2>, scalar_prefetch = 0 : i64, scratch_operands = 0 : i64, tpu.core_type = #tpu.core_type<tc>, window_params = [{transform_indices = @transform_0, window_bounds = array<i64: 8, 32>}, {pipeline_mode = #tpu.pipeline_mode<synchronous>, transform_indices = @transform_1, window_bounds = array<i64: 32, 64>}, {pipeline_mode = #tpu.pipeline_mode<synchronous>, transform_indices = @transform_2, window_bounds = array<i64: 1, 64>}, {transform_indices = @transform_3, window_bounds = array<i64: 8, 64>}]} {
    %c0 = arith.constant 0 : index
    %c0_0 = arith.constant 0 : index
    %0 = vector.load %arg1[%c0, %c0_0] : memref<8x32xf32, #tpu.memory_space<vmem>>, vector<8x32xf32>
    %c0_1 = arith.constant 0 : index
    %c0_2 = arith.constant 0 : index
    %1 = vector.load %arg2[%c0_1, %c0_2] : memref<32x64xf32, #tpu.memory_space<vmem>>, vector<32x64xf32>
    %cst = arith.constant dense<0.000000e+00> : vector<8x64xf32>
    %2 = tpu.matmul %0, %1, %cst {dimension_numbers = #tpu.dot_dimension_numbers<[1], [0], [0], [1], [0, 0, 1, 1], [], []>} : vector<8x32xf32>, vector<32x64xf32>, vector<8x64xf32> -> vector<8x64xf32>
    %c0_3 = arith.constant 0 : index
    %c0_4 = arith.constant 0 : index
    %3 = vector.load %arg3[%c0_3, %c0_4] : memref<1x64xf32, #tpu.memory_space<vmem>>, vector<1x64xf32>
    %4 = vector.broadcast %3 : vector<1x64xf32> to vector<8x64xf32>
    %5 = arith.addf %2, %4 : vector<8x64xf32>
    %c0_5 = arith.constant 0 : index
    %c0_6 = arith.constant 0 : index
    %6 = vector.load %arg4[%c0_5, %c0_6] : memref<8x64xf32, #tpu.memory_space<vmem>>, vector<8x64xf32>
    tpu.vector_store %arg4[%c0_5, %c0_6], %5 {strides = array<i32>} : memref<8x64xf32, #tpu.memory_space<vmem>>, vector<8x64xf32>,
    return
  }
  func.func @transform_0(%arg0: i32) -> (i32, i32) {
    %c0_i32 = arith.constant 0 : i32
    %c0_i32_0 = arith.constant 0 : i32
    return %arg0, %c0_i32 : i32, i32
  }
  func.func @transform_1(%arg0: i32) -> (i32, i32) {
    %c0_i32 = arith.constant 0 : i32
    %c0_i32_0 = arith.constant 0 : i32
    %c0_i32_1 = arith.constant 0 : i32
    return %c0_i32, %c0_i32_0 : i32, i32
  }
  func.func @transform_2(%arg0: i32) -> (i32, i32) {
    %c0_i32 = arith.constant 0 : i32
    %c0_i32_0 = arith.constant 0 : i32
    %c0_i32_1 = arith.constant 0 : i32
    return %c0_i32, %c0_i32_0 : i32, i32
  }
  func.func @transform_3(%arg0: i32) -> (i32, i32) {
    %c0_i32 = arith.constant 0 : i32
    %c0_i32_0 = arith.constant 0 : i32
    return %arg0, %c0_i32 : i32, i32
  }
}

module attributes {stable_mosaic.version = 11 : i64} {
  func.func @_linear_kernel(%arg0: i32, %arg1: memref<8x32xf32, #tpu.memory_space<vmem>>, %arg2: memref<32x32xf32, #tpu.memory_space<vmem>>, %arg3: memref<1x32xf32, #tpu.memory_space<vmem>>, %arg4: memref<8x32xf32, #tpu.memory_space<vmem>>) attributes {dimension_semantics = [#tpu.dimension_semantics<parallel>], iteration_bounds = array<i64: 2>, scalar_prefetch = 0 : i64, scratch_operands = 0 : i64, tpu.core_type = #tpu.core_type<tc>, window_params = [{transform_indices = @transform_0, window_bounds = array<i64: 8, 32>}, {pipeline_mode = #tpu.pipeline_mode<synchronous>, transform_indices = @transform_1, window_bounds = array<i64: 32, 32>}, {pipeline_mode = #tpu.pipeline_mode<synchronous>, transform_indices = @transform_2, window_bounds = array<i64: 1, 32>}, {transform_indices = @transform_3, window_bounds = array<i64: 8, 32>}]} {
    %c0 = arith.constant 0 : index
    %c0_0 = arith.constant 0 : index
    %0 = vector.load %arg1[%c0, %c0_0] : memref<8x32xf32, #tpu.memory_space<vmem>>, vector<8x32xf32>
    %c0_1 = arith.constant 0 : index
    %c0_2 = arith.constant 0 : index
    %1 = vector.load %arg2[%c0_1, %c0_2] : memref<32x32xf32, #tpu.memory_space<vmem>>, vector<32x32xf32>
    %cst = arith.constant dense<0.000000e+00> : vector<8x32xf32>
    %2 = tpu.matmul %0, %1, %cst {dimension_numbers = #tpu.dot_dimension_numbers<[1], [0], [0], [1], [0, 0, 1, 1], [], []>} : vector<8x32xf32>, vector<32x32xf32>, vector<8x32xf32> -> vector<8x32xf32>
    %c0_3 = arith.constant 0 : index
    %c0_4 = arith.constant 0 : index
    %3 = vector.load %arg3[%c0_3, %c0_4] : memref<1x32xf32, #tpu.memory_space<vmem>>, vector<1x32xf32>
    %4 = vector.broadcast %3 : vector<1x32xf32> to vector<8x32xf32>
    %5 = arith.addf %2, %4 : vector<8x32xf32>
    %c0_5 = arith.constant 0 : index
    %c0_6 = arith.constant 0 : index
    %6 = vector.load %arg4[%c0_5, %c0_6] : memref<8x32xf32, #tpu.memory_space<vmem>>, vector<8x32xf32>
    tpu.vector_store %arg4[%c0_5, %c0_6], %5 {strides = array<i32>} : memref<8x32xf32, #tpu.memory_space<vmem>>, vector<8x32xf32>,
    return
  }
  func.func @transform_0(%arg0: i32) -> (i32, i32) {
    %c0_i32 = arith.constant 0 : i32
    %c0_i32_0 = arith.constant 0 : i32
    return %arg0, %c0_i32 : i32, i32
  }
  func.func @transform_1(%arg0: i32) -> (i32, i32) {
    %c0_i32 = arith.constant 0 : i32
    %c0_i32_0 = arith.constant 0 : i32
    %c0_i32_1 = arith.constant 0 : i32
    return %c0_i32, %c0_i32_0 : i32, i32
  }
  func.func @transform_2(%arg0: i32) -> (i32, i32) {
    %c0_i32 = arith.constant 0 : i32
    %c0_i32_0 = arith.constant 0 : i32
    %c0_i32_1 = arith.constant 0 : i32
    return %c0_i32, %c0_i32_0 : i32, i32
  }
  func.func @transform_3(%arg0: i32) -> (i32, i32) {
    %c0_i32 = arith.constant 0 : i32
    %c0_i32_0 = arith.constant 0 : i32
    return %arg0, %c0_i32 : i32, i32
  }
}

module attributes {stable_mosaic.version = 11 : i64} {
  func.func @_linear_kernel(%arg0: i32, %arg1: memref<8x32xf32, #tpu.memory_space<vmem>>, %arg2: memref<32x128xf32, #tpu.memory_space<vmem>>, %arg3: memref<1x128xf32, #tpu.memory_space<vmem>>, %arg4: memref<8x128xf32, #tpu.memory_space<vmem>>) attributes {dimension_semantics = [#tpu.dimension_semantics<parallel>], iteration_bounds = array<i64: 2>, scalar_prefetch = 0 : i64, scratch_operands = 0 : i64, tpu.core_type = #tpu.core_type<tc>, window_params = [{transform_indices = @transform_0, window_bounds = array<i64: 8, 32>}, {pipeline_mode = #tpu.pipeline_mode<synchronous>, transform_indices = @transform_1, window_bounds = array<i64: 32, 128>}, {pipeline_mode = #tpu.pipeline_mode<synchronous>, transform_indices = @transform_2, window_bounds = array<i64: 1, 128>}, {transform_indices = @transform_3, window_bounds = array<i64: 8, 128>}]} {
    %c0 = arith.constant 0 : index
    %c0_0 = arith.constant 0 : index
    %0 = vector.load %arg1[%c0, %c0_0] : memref<8x32xf32, #tpu.memory_space<vmem>>, vector<8x32xf32>
    %c0_1 = arith.constant 0 : index
    %c0_2 = arith.constant 0 : index
    %1 = vector.load %arg2[%c0_1, %c0_2] : memref<32x128xf32, #tpu.memory_space<vmem>>, vector<32x128xf32>
    %cst = arith.constant dense<0.000000e+00> : vector<8x128xf32>
    %2 = tpu.matmul %0, %1, %cst {dimension_numbers = #tpu.dot_dimension_numbers<[1], [0], [0], [1], [0, 0, 1, 1], [], []>} : vector<8x32xf32>, vector<32x128xf32>, vector<8x128xf32> -> vector<8x128xf32>
    %c0_3 = arith.constant 0 : index
    %c0_4 = arith.constant 0 : index
    %3 = vector.load %arg3[%c0_3, %c0_4] : memref<1x128xf32, #tpu.memory_space<vmem>>, vector<1x128xf32>
    %4 = vector.broadcast %3 : vector<1x128xf32> to vector<8x128xf32>
    %5 = arith.addf %2, %4 : vector<8x128xf32>
    %c0_5 = arith.constant 0 : index
    %c0_6 = arith.constant 0 : index
    %6 = vector.load %arg4[%c0_5, %c0_6] : memref<8x128xf32, #tpu.memory_space<vmem>>, vector<8x128xf32>
    tpu.vector_store %arg4[%c0_5, %c0_6], %5 {strides = array<i32>} : memref<8x128xf32, #tpu.memory_space<vmem>>, vector<8x128xf32>,
    return
  }
  func.func @transform_0(%arg0: i32) -> (i32, i32) {
    %c0_i32 = arith.constant 0 : i32
    %c0_i32_0 = arith.constant 0 : i32
    return %arg0, %c0_i32 : i32, i32
  }
  func.func @transform_1(%arg0: i32) -> (i32, i32) {
    %c0_i32 = arith.constant 0 : i32
    %c0_i32_0 = arith.constant 0 : i32
    %c0_i32_1 = arith.constant 0 : i32
    return %c0_i32, %c0_i32_0 : i32, i32
  }
  func.func @transform_2(%arg0: i32) -> (i32, i32) {
    %c0_i32 = arith.constant 0 : i32
    %c0_i32_0 = arith.constant 0 : i32
    %c0_i32_1 = arith.constant 0 : i32
    return %c0_i32, %c0_i32_0 : i32, i32
  }
  func.func @transform_3(%arg0: i32) -> (i32, i32) {
    %c0_i32 = arith.constant 0 : i32
    %c0_i32_0 = arith.constant 0 : i32
    return %arg0, %c0_i32 : i32, i32
  }
}

module attributes {stable_mosaic.version = 11 : i64} {
  func.func @_ln_kernel(%arg0: i32, %arg1: memref<8x32xf32, #tpu.memory_space<vmem>>, %arg2: memref<1x32xf32, #tpu.memory_space<vmem>>, %arg3: memref<1x32xf32, #tpu.memory_space<vmem>>, %arg4: memref<8x32xf32, #tpu.memory_space<vmem>>) attributes {dimension_semantics = [#tpu.dimension_semantics<parallel>], iteration_bounds = array<i64: 2>, scalar_prefetch = 0 : i64, scratch_operands = 0 : i64, tpu.core_type = #tpu.core_type<tc>, window_params = [{transform_indices = @transform_0, window_bounds = array<i64: 8, 32>}, {pipeline_mode = #tpu.pipeline_mode<synchronous>, transform_indices = @transform_1, window_bounds = array<i64: 1, 32>}, {pipeline_mode = #tpu.pipeline_mode<synchronous>, transform_indices = @transform_2, window_bounds = array<i64: 1, 32>}, {transform_indices = @transform_3, window_bounds = array<i64: 8, 32>}]} {
    %c0 = arith.constant 0 : index
    %c0_0 = arith.constant 0 : index
    %0 = vector.load %arg1[%c0, %c0_0] : memref<8x32xf32, #tpu.memory_space<vmem>>, vector<8x32xf32>
    %c0_1 = arith.constant 0 : index
    %c0_2 = arith.constant 0 : index
    %1 = vector.load %arg2[%c0_1, %c0_2] : memref<1x32xf32, #tpu.memory_space<vmem>>, vector<1x32xf32>
    %c0_3 = arith.constant 0 : index
    %c0_4 = arith.constant 0 : index
    %2 = vector.load %arg3[%c0_3, %c0_4] : memref<1x32xf32, #tpu.memory_space<vmem>>, vector<1x32xf32>
    %cst = arith.constant dense<0.000000e+00> : vector<8xf32>
    %3 = vector.multi_reduction <add>, %0, %cst [1] : vector<8x32xf32> to vector<8xf32>
    %4 = vector.shape_cast %3 : vector<8xf32> to vector<8x1xf32>
    %cst_5 = arith.constant 3.200000e+01 : f32
    %5 = vector.broadcast %cst_5 : f32 to vector<8x1xf32>
    %6 = arith.divf %4, %5 : vector<8x1xf32>
    %7 = vector.broadcast %6 : vector<8x1xf32> to vector<8x32xf32>
    %8 = arith.subf %0, %7 : vector<8x32xf32>
    %9 = arith.mulf %8, %8 : vector<8x32xf32>
    %cst_6 = arith.constant dense<0.000000e+00> : vector<8xf32>
    %10 = vector.multi_reduction <add>, %9, %cst_6 [1] : vector<8x32xf32> to vector<8xf32>
    %11 = vector.shape_cast %10 : vector<8xf32> to vector<8x1xf32>
    %cst_7 = arith.constant 3.200000e+01 : f32
    %12 = vector.broadcast %cst_7 : f32 to vector<8x1xf32>
    %13 = arith.divf %11, %12 : vector<8x1xf32>
    %14 = vector.broadcast %6 : vector<8x1xf32> to vector<8x32xf32>
    %15 = arith.subf %0, %14 : vector<8x32xf32>
    %cst_8 = arith.constant 9.99999974E-6 : f32
    %16 = vector.broadcast %cst_8 : f32 to vector<8x1xf32>
    %17 = arith.addf %13, %16 : vector<8x1xf32>
    %18 = math.rsqrt %17 : vector<8x1xf32>
    %19 = vector.broadcast %18 : vector<8x1xf32> to vector<8x32xf32>
    %20 = arith.mulf %15, %19 : vector<8x32xf32>
    %21 = vector.broadcast %1 : vector<1x32xf32> to vector<8x32xf32>
    %22 = arith.mulf %20, %21 : vector<8x32xf32>
    %23 = vector.broadcast %2 : vector<1x32xf32> to vector<8x32xf32>
    %24 = arith.addf %22, %23 : vector<8x32xf32>
    %c0_9 = arith.constant 0 : index
    %c0_10 = arith.constant 0 : index
    %25 = vector.load %arg4[%c0_9, %c0_10] : memref<8x32xf32, #tpu.memory_space<vmem>>, vector<8x32xf32>
    tpu.vector_store %arg4[%c0_9, %c0_10], %24 {strides = array<i32>} : memref<8x32xf32, #tpu.memory_space<vmem>>, vector<8x32xf32>,
    return
  }
  func.func @transform_0(%arg0: i32) -> (i32, i32) {
    %c0_i32 = arith.constant 0 : i32
    %c0_i32_0 = arith.constant 0 : i32
    return %arg0, %c0_i32 : i32, i32
  }
  func.func @transform_1(%arg0: i32) -> (i32, i32) {
    %c0_i32 = arith.constant 0 : i32
    %c0_i32_0 = arith.constant 0 : i32
    %c0_i32_1 = arith.constant 0 : i32
    return %c0_i32, %c0_i32_0 : i32, i32
  }
  func.func @transform_2(%arg0: i32) -> (i32, i32) {
    %c0_i32 = arith.constant 0 : i32
    %c0_i32_0 = arith.constant 0 : i32
    %c0_i32_1 = arith.constant 0 : i32
    return %c0_i32, %c0_i32_0 : i32, i32
  }
  func.func @transform_3(%arg0: i32) -> (i32, i32) {
    %c0_i32 = arith.constant 0 : i32
    %c0_i32_0 = arith.constant 0 : i32
    return %arg0, %c0_i32 : i32, i32
  }
}

</mosaic_0001>

<bundles_post_ra>
// kernel: fwd.30
= control target key start
LH: loop header
LB: loop body
LE: loop exit
PB: predicated region body
PF: predicated region fallthrough
CT: control target
= control target key end

     0   :  { %s676_s24 = smov 0   ;;  %s752_s0 = inlined_call_operand.vmem [shape: f32[16,32], index: 0, kind: input, shape index: {}]   ;;  %s753_s1 = inlined_call_operand.vmem [shape: f32[32,64], index: 1, kind: input, shape index: {}]   ;;  %s754_s2 = inlined_call_operand.vmem [shape: f32[1,64], index: 2, kind: input, shape index: {}]   ;;  %s755_s3 = inlined_call_operand.vmem [shape: f32[64,32], index: 3, kind: input, shape index: {}]   ;;  %s756_s4 = inlined_call_operand.vmem [shape: f32[1,32], index: 4, kind: input, shape index: {}]   ;;  %s757_s5 = inlined_call_operand.vmem [shape: f32[1,32], index: 5, kind: input, shape index: {}]   ;;  %s758_s6 = inlined_call_operand.vmem [shape: f32[1,32], index: 6, kind: input, shape index: {}]   ;;  %s759_s7 = inlined_call_operand.vmem [shape: f32[16,32], index: 7, kind: output, shape index: {}]  }
   0x1 LB: > { %s535_s25 = sadd.s32 4294967295, %s631_s24   ;;  %p539_p0 = scmp.ge.s32.totalorder %s631_s24, 1  ;;  %s631_s24 = sphi %s676_s24, %s17_s24  }
   0x2   : > { %p236_p1 = scmp.lt.s32.totalorder %s631_s24, 3 }
   0x4   : > { %p237_p2 = pnand %p539_p0, %p236_p1 }
   0x5   : > { %v275_v0 = vld [vmem:[%s753_s1] sm:$0xff] (!%p237_p2)  ;;  %v276_v1 = vld [vmem:[%s753_s1 + $0x8] sm:$0xff] (!%p237_p2)  ;;  %v277_v2 = vld [vmem:[%s753_s1 + $0x10] sm:$0xff] (!%p237_p2)  ;;  %v633_v3 = vmov (!%p237_p2), 0.0|0.0   ;;  %vm634_vm0 = vmmov (!%p237_p2), 0   ;;  %v635_v6 = vmov (!%p237_p2), 0.0  }
   0x6   : > { %240 = sbr.rel (%p237_p2) target bundleno = 763 (0x2fb), region = 48  ;;  %594 = vmatprep.subr.bf16.mxu0 (!%p237_p2), %v633_v3  ;;  %v595_v4 = vpack.c.bf16 (!%p237_p2), %v276_v1, %v275_v0  ;;  %v278_v5 = vld [vmem:[%s753_s1 + $0x18] sm:$0xff] (!%p237_p2)  ;;  %572 = vmatprep.mubr.msk.f32.mxu0 (!%p237_p2), %vm634_vm0, %v635_v6  ;;  %p266_p3 = scmp.lt.s32.totalorder (!%p237_p2), %s535_s25, 1  ;;  %v361_v7 = vld [vmem:[%s755_s3] sm:$0xff] (!%p237_p2)  ;;  %v362_v8 = vld [vmem:[%s755_s3 + $0x8] sm:$0xff] (!%p237_p2)  ;;  %vm286_vm1 = vcmask (!%p237_p2), 261120  }
   0x7   : > { %600 = vmatprep.subr.bf16.mxu1 (!%p237_p2), %v633_v3  ;;  %v601_v9 = vpack.c.bf16 (!%p237_p2), %v362_v8, %v361_v7  ;;  %v363_v10 = vld [vmem:[%s755_s3 + $0x10] sm:$0xff] (!%p237_p2)  ;;  %v364_v11 = vld [vmem:[%s755_s3 + $0x18] sm:$0xff] (!%p237_p2)  ;;  %591 = vmatprep.mubr.msk.f32.mxu1 (!%p237_p2), %vm634_vm0, %v635_v6  ;;  %v598_v12 = vpack.c.bf16 (!%p237_p2), %v278_v5, %v277_v2  ;;  %v365_v14 = vld [vmem:[%s755_s3 + $0x20] sm:$0xff] (!%p237_p2)  ;;  %vm376_vm2 = vcmask (!%p237_p2), 523264  }
   0x8   : > { %596 = vmatpush3.bf16.msra.mxu0 (!%p237_p2), %v595_v4  ;;  %v604_v13 = vpack.c.bf16 (!%p237_p2), %v364_v11, %v363_v10  ;;  %v366_v15 = vld [vmem:[%s755_s3 + $0x28] sm:$0xff] (!%p237_p2)  ;;  %v367_v18 = vld [vmem:[%s755_s3 + $0x30] sm:$0xff] (!%p237_p2)  ;;  %v368_v19 = vld [vmem:[%s755_s3 + $0x38] sm:$0xff] (!%p237_p2) }
   0x9   : > { %597 = vmatprep.subr.bf16.mxu0 (!%p237_p2), %v633_v3  ;;  %602 = vmatpush3.bf16.msra.mxu1 (!%p237_p2), %v601_v9  ;;  %v607_v17 = vpack.c.bf16 (!%p237_p2), %v366_v15, %v365_v14  ;;  %v610_v20 = vpack.c.bf16 (!%p237_p2), %v368_v19, %v367_v18  ;;  %v542_v21 = vld [vmem:[%s754_s2] ss:$0 sm:$0xff] (!%p237_p2) }
   0xa   : > { %603 = vmatprep.subr.bf16.mxu1 (!%p237_p2), %v633_v3  ;;  %v544_v26 = vld [vmem:[%s756_s4] ss:$0 sm:$0xff] (!%p237_p2) }
   0xb   : > { %v546_v41 = vld [vmem:[%s757_s5] ss:$0 sm:$0xff] (!%p237_p2) }
   0xc   : > { %599 = vmatpush3.bf16.msra.mxu0 (!%p237_p2), %v598_v12  ;;  %v547_v43 = vld [vmem:[%s758_s6] ss:$0 sm:$0xff] (!%p237_p2) }
   0xd   : > { %s761_s25 = smov (!%p266_p3, %s535_s25), 1  ;;  %605 = vmatpush3.bf16.msra.mxu1 %v604_v13 }
   0xe   : > { %s540_s19 = sshll.u32 %s761_s25, 3  ;;  %606 = vmatprep.subr.bf16.mxu1 %v633_v3 }
   0xf   : > { %s269_s28 = scalar_lea.vmem %s752_s0, %s540_s19  ;;  %s273_s21 = scalar_lea.vmem %s759_s7, %s540_s19 }
  0x10   : > { %v274_v16 = vld [vmem:[%s269_s28] sm:$0xff] }
  0x11   : > { %573 = vmatmul.mubr.msk.f32.vlgmr.msra.gmra.mrb[0].mxu0 %vm286_vm1, %v274_v16  ;;  %608 = vmatpush3.bf16.msra.mxu1 %v607_v17 }
  0x12   : > { %609 = vmatprep.subr.bf16.mxu1 %v633_v3 }
  0x15   : > { %611 = vmatpush3.bf16.msra.mxu1 %v610_v20 }
  0xe4   : > { %v356_v22 = vpop.f32.mrb[0].mxu0 }
  0xe5   : > { %v357_v23 = vadd.f32 %v542_v21, %v356_v22  ;;  %v574_v24 = vpop.f32.mrb[1].mxu0 }
  0xe7   : > { %v360_v25 = vmax.f32 %v357_v23, 0.0 }
  0xe9   : > { %592 = vmatmul.mubr.msk.f32.vlgmr.msra.gmra.mrb[0].mxu1 %vm376_vm2, %v360_v25 }
 0x1bc   : > { %v446_v27 = vpop.f32.mrb[0].mxu1 }
 0x1bd   : > { %v447_v28 = vadd.f32 %v544_v26, %v446_v27  ;;  %v593_v29 = vpop.f32.mrb[1].mxu1 }
 0x1bf   : > { %v450_v30 = vadd.f32 %v447_v28, %v274_v16 }
 0x1c1   : > { %v453_v31 = vsel %vm286_vm1, %v450_v30, 0.0 }
 0x1c2   : > { %454 = vadd.xlane.f32.xlu0 %v453_v31 }
 0x24f   : > { %v455_v32 = vpop.xlane.xlu0 %454 }
 0x250   : > { %v457_v33 = vmul.f32 0.03125, %v455_v32 }
 0x252   : > { %v458_v34 = vsub.f32 %v450_v30, %v457_v33 }
 0x254   : > { %v459_v35 = vmul.f32 %v458_v34, %v458_v34 }
 0x256   : > { %v460_v36 = vsel %vm286_vm1, %v459_v35, 0.0 }
 0x257   : > { %461 = vadd.xlane.f32.xlu0 %v460_v36 }
 0x2e4   : > { %v462_v37 = vpop.xlane.xlu0 %461 }
 0x2e5   : > { %v463_v38 = vmul.f32 0.03125, %v462_v37 }
 0x2e7   : > { %v464_v39 = vadd.f32 1e-05, %v463_v38 }
 0x2e9   : > { %623 = vrsqrt.f32 %v464_v39 }
 0x2f3   : > { %v624_v40 = vpop.eup %623 }
 0x2f4   : > { %v466_v42 = vmul.f32 %v624_v40, %v458_v34 }
 0x2f6   : > { %v473_v44 = vmul.f32 %v546_v41, %v466_v42 }
 0x2f8   : > { %v480_v45 = vadd.f32 %v547_v43, %v473_v44 }
 0x2fa   : > { %481 = vst.msk [vmem:[%s273_s21] sm:$0xff] %vm286_vm1, %v480_v45 }
 0x2fb PF: > { %s17_s24 = sadd.s32 1, %s631_s24  }
 0x2fc   : > { %p14_p4 = scmp.ge.s32.totalorder %s17_s24, 4  }
 0x2fe   :  { %16 = sbr.rel (!%p14_p4) target bundleno = 1 (0x1), region = 78 }

// kernel: fwd.27
= control target key start
LH: loop header
LB: loop body
LE: loop exit
PB: predicated region body
PF: predicated region fallthrough
CT: control target
= control target key end

     0   :  { %s382_s12 = smov 0   ;;  %s414_s0 = inlined_call_operand.vmem [shape: f32[16,32], index: 0, kind: input, shape index: {}]   ;;  %s415_s1 = inlined_call_operand.vmem [shape: f32[32,96], index: 1, kind: input, shape index: {}]   ;;  %s416_s2 = inlined_call_operand.vmem [shape: f32[1,96], index: 2, kind: input, shape index: {}]   ;;  %s417_s3 = inlined_call_operand.vmem [shape: f32[16,96], index: 3, kind: output, shape index: {}]  }
   0x1 LB: > { %s307_s13 = sadd.s32 4294967295, %s357_s12   ;;  %p311_p0 = scmp.ge.s32.totalorder %s357_s12, 1  ;;  %s357_s12 = sphi %s382_s12, %s13_s12  }
   0x2   : > { %p136_p1 = scmp.lt.s32.totalorder %s357_s12, 3 }
   0x4   : > { %p137_p2 = pnand %p311_p0, %p136_p1 }
   0x5   : > { %v167_v0 = vld [vmem:[%s415_s1] sm:$0xff] (!%p137_p2)  ;;  %v168_v1 = vld [vmem:[%s415_s1 + $0x8] sm:$0xff] (!%p137_p2)  ;;  %v169_v2 = vld [vmem:[%s415_s1 + $0x10] sm:$0xff] (!%p137_p2)  ;;  %v359_v3 = vmov (!%p137_p2), 0.0|0.0   ;;  %vm360_vm0 = vmmov (!%p137_p2), 0   ;;  %v361_v6 = vmov (!%p137_p2), 0.0  }
   0x6   : > { %140 = sbr.rel (%p137_p2) target bundleno = 232 (0xe8), region = 32  ;;  %334 = vmatprep.subr.bf16.mxu0 (!%p137_p2), %v359_v3  ;;  %v335_v4 = vpack.c.bf16 (!%p137_p2), %v168_v1, %v167_v0  ;;  %v170_v5 = vld [vmem:[%s415_s1 + $0x18] sm:$0xff] (!%p137_p2)  ;;  %331 = vmatprep.mubr.msk.f32.mxu0 (!%p137_p2), %vm360_vm0, %v361_v6  ;;  %p158_p3 = scmp.lt.s32.totalorder (!%p137_p2), %s307_s13, 1  ;;  %vm178_vm1 = vcmask (!%p137_p2), 261120   ;;  %v314_v9 = vld [vmem:[%s416_s2] ss:$0 sm:$0xff] (!%p137_p2) }
   0x7   : > { %v338_v7 = vpack.c.bf16 (!%p137_p2), %v170_v5, %v169_v2  ;;  %vm252_vm2 = vcmask (!%p137_p2), 785408  }
   0x8   : > { %336 = vmatpush3.bf16.msra.mxu0 (!%p137_p2), %v335_v4 }
   0x9   : > { %337 = vmatprep.subr.bf16.mxu0 (!%p137_p2), %v359_v3 }
   0xc   : > { %339 = vmatpush3.bf16.msra.mxu0 (!%p137_p2), %v338_v7 }
   0xd   : > { %s419_s13 = smov (!%p158_p3, %s307_s13), 1 }
   0xe   : > { %s312_s22 = sshll.u32 %s419_s13, 3 }
   0xf   : > { %s161_s25 = scalar_lea.vmem %s414_s0, %s312_s22  ;;  %s165_s30 = scalar_lea.vmem %s417_s3, %s312_s22 }
  0x10   : > { %v166_v8 = vld [vmem:[%s161_s25] sm:$0xff] }
  0x11   : > { %332 = vmatmul.mubr.msk.f32.vlgmr.msra.gmra.mrb[0].mxu0 %vm178_vm1, %v166_v8 }
  0xe4   : > { %v248_v10 = vpop.f32.mrb[0].mxu0 }
  0xe5   : > { %v249_v11 = vadd.f32 %v314_v9, %v248_v10  ;;  %v333_v12 = vpop.f32.mrb[1].mxu0 }
  0xe7   : > { %253 = vst.msk [vmem:[%s165_s30] sm:$0xff] %vm252_vm2, %v249_v11 }
  0xe8 PF: > { %s13_s12 = sadd.s32 1, %s357_s12  }
  0xe9   : > { %p10_p4 = scmp.ge.s32.totalorder %s13_s12, 4  }
  0xeb   :  { %12 = sbr.rel (!%p10_p4) target bundleno = 1 (0x1), region = 62 }

// kernel: fwd.29
= control target key start
LH: loop header
LB: loop body
LE: loop exit
PB: predicated region body
PF: predicated region fallthrough
CT: control target
= control target key end

     0   :  { %s543_s21 = smov 0   ;;  %s593_s0 = inlined_call_operand.vmem [shape: f32[16,32], index: 0, kind: input, shape index: {}]   ;;  %s594_s1 = inlined_call_operand.vmem [shape: f32[32,32], index: 1, kind: input, shape index: {}]   ;;  %s595_s2 = inlined_call_operand.vmem [shape: f32[1,32], index: 2, kind: input, shape index: {}]   ;;  %s596_s3 = inlined_call_operand.vmem [shape: f32[16,32], index: 3, kind: input, shape index: {}]   ;;  %s597_s4 = inlined_call_operand.vmem [shape: f32[1,32], index: 4, kind: input, shape index: {}]   ;;  %s598_s5 = inlined_call_operand.vmem [shape: f32[1,32], index: 5, kind: input, shape index: {}]   ;;  %s599_s6 = inlined_call_operand.vmem [shape: f32[16,32], index: 6, kind: output, shape index: {}]  }
   0x1 LB: > { %s448_s22 = sadd.s32 4294967295, %s503_s21   ;;  %p452_p0 = scmp.ge.s32.totalorder %s503_s21, 1  ;;  %s503_s21 = sphi %s543_s21, %s16_s21  }
   0x2   : > { %p220_p1 = scmp.lt.s32.totalorder %s503_s21, 3 }
   0x4   : > { %p221_p2 = pnand %p452_p0, %p220_p1 }
   0x5   : > { %v265_v0 = vld [vmem:[%s594_s1] sm:$0xff] (!%p221_p2)  ;;  %v266_v1 = vld [vmem:[%s594_s1 + $0x8] sm:$0xff] (!%p221_p2)  ;;  %v267_v2 = vld [vmem:[%s594_s1 + $0x10] sm:$0xff] (!%p221_p2)  ;;  %v505_v3 = vmov (!%p221_p2), 0.0|0.0   ;;  %vm506_vm0 = vmmov (!%p221_p2), 0   ;;  %v507_v6 = vmov (!%p221_p2), 0.0  }
   0x6   : > { %224 = sbr.rel (%p221_p2) target bundleno = 547 (0x223), region = 44  ;;  %478 = vmatprep.subr.bf16.mxu0 (!%p221_p2), %v505_v3  ;;  %v479_v4 = vpack.c.bf16 (!%p221_p2), %v266_v1, %v265_v0  ;;  %v268_v5 = vld [vmem:[%s594_s1 + $0x18] sm:$0xff] (!%p221_p2)  ;;  %475 = vmatprep.mubr.msk.f32.mxu0 (!%p221_p2), %vm506_vm0, %v507_v6  ;;  %p252_p3 = scmp.lt.s32.totalorder (!%p221_p2), %s448_s22, 1  ;;  %vm276_vm1 = vcmask (!%p221_p2), 261120   ;;  %v456_v9 = vld [vmem:[%s595_s2] ss:$0 sm:$0xff] (!%p221_p2) }
   0x7   : > { %v482_v7 = vpack.c.bf16 (!%p221_p2), %v268_v5, %v267_v2  ;;  %v458_v25 = vld [vmem:[%s597_s4] ss:$0 sm:$0xff] (!%p221_p2) }
   0x8   : > { %480 = vmatpush3.bf16.msra.mxu0 (!%p221_p2), %v479_v4  ;;  %v459_v27 = vld [vmem:[%s598_s5] ss:$0 sm:$0xff] (!%p221_p2) }
   0x9   : > { %481 = vmatprep.subr.bf16.mxu0 (!%p221_p2), %v505_v3 }
   0xc   : > { %483 = vmatpush3.bf16.msra.mxu0 (!%p221_p2), %v482_v7 }
   0xd   : > { %s601_s22 = smov (!%p252_p3, %s448_s22), 1 }
   0xe   : > { %s563_s7 = sshll.u32 %s601_s22, 3 }
   0xf   : > { %s255_s10 = scalar_lea.vmem %s593_s0, %s563_s7  ;;  %s259_s13 = scalar_lea.vmem %s596_s3, %s563_s7 }
  0x10   : > { %v264_v8 = vld [vmem:[%s255_s10] sm:$0xff]  ;;  %s263_s23 = scalar_lea.vmem %s599_s6, %s563_s7 }
  0x11   : > { %476 = vmatmul.mubr.msk.f32.vlgmr.msra.gmra.mrb[0].mxu0 %vm276_vm1, %v264_v8  ;;  %v350_v11 = vld [vmem:[%s259_s13] sm:$0xff] }
  0xe4   : > { %v346_v10 = vpop.f32.mrb[0].mxu0 }
  0xe5   : > { %v347_v12 = vadd.f32 %v456_v9, %v346_v10  ;;  %v477_v13 = vpop.f32.mrb[1].mxu0 }
  0xe7   : > { %v351_v14 = vadd.f32 %v350_v11, %v347_v12 }
  0xe9   : > { %v354_v15 = vsel %vm276_vm1, %v351_v14, 0.0 }
  0xea   : > { %355 = vadd.xlane.f32.xlu0 %v354_v15 }
 0x177   : > { %v356_v16 = vpop.xlane.xlu0 %355 }
 0x178   : > { %v358_v17 = vmul.f32 0.03125, %v356_v16 }
 0x17a   : > { %v359_v18 = vsub.f32 %v351_v14, %v358_v17 }
 0x17c   : > { %v360_v19 = vmul.f32 %v359_v18, %v359_v18 }
 0x17e   : > { %v361_v20 = vsel %vm276_vm1, %v360_v19, 0.0 }
 0x17f   : > { %362 = vadd.xlane.f32.xlu0 %v361_v20 }
 0x20c   : > { %v363_v21 = vpop.xlane.xlu0 %362 }
 0x20d   : > { %v364_v22 = vmul.f32 0.03125, %v363_v21 }
 0x20f   : > { %v365_v23 = vadd.f32 1e-05, %v364_v22 }
 0x211   : > { %495 = vrsqrt.f32 %v365_v23 }
 0x21b   : > { %v496_v24 = vpop.eup %495 }
 0x21c   : > { %v367_v26 = vmul.f32 %v496_v24, %v359_v18 }
 0x21e   : > { %v374_v28 = vmul.f32 %v458_v25, %v367_v26 }
 0x220   : > { %v381_v29 = vadd.f32 %v459_v27, %v374_v28 }
 0x222   : > { %382 = vst.msk [vmem:[%s263_s23] sm:$0xff] %vm276_vm1, %v381_v29 }
 0x223 PF: > { %s16_s21 = sadd.s32 1, %s503_s21  }
 0x224   : > { %p13_p4 = scmp.ge.s32.totalorder %s16_s21, 4  }
 0x226   :  { %15 = sbr.rel (!%p13_p4) target bundleno = 1 (0x1), region = 77 }

// kernel: fwd.28
= control target key start
LH: loop header
LB: loop body
LE: loop exit
PB: predicated region body
PF: predicated region fallthrough
CT: control target
= control target key end

     0   :  { %s1174_s15 = smov 0   ;;  %s1268_s0 = inlined_call_operand.vmem [shape: f32[2,8,32], index: 0, kind: input, shape index: {}]   ;;  %s1269_s1 = inlined_call_operand.vmem [shape: f32[2,8,32], index: 1, kind: input, shape index: {}]   ;;  %s1270_s2 = inlined_call_operand.vmem [shape: f32[2,8,32], index: 2, kind: input, shape index: {}]   ;;  %s1271_s3 = inlined_call_operand.vmem [shape: f32[2,8,8], index: 3, kind: input, shape index: {}]   ;;  %s1272_s4 = inlined_call_operand.vmem [shape: f32[2,8,32], index: 4, kind: output, shape index: {}]  }
   0x1 LB: > { %s1021_s16 = sadd.s32 4294967295, %s1139_s15   ;;  %p1025_p0 = scmp.ge.s32.totalorder %s1139_s15, 1  ;;  %s1139_s15 = sphi %s1174_s15, %s14_s15  }
   0x2   : > { %p188_p1 = scmp.lt.s32.totalorder %s1139_s15, 3 }
   0x4   : > { %p189_p2 = pnand %p1025_p0, %p188_p1 }
   0x5   : > { %p224_p3 = scmp.lt.s32.totalorder (!%p189_p2), %s1021_s16, 1  ;;  %v1141_v0 = vmov (!%p189_p2), 0.0   ;;  %vm1142_vm0 = vmmov (!%p189_p2), 0   ;;  %vm248_vm1 = vcmask (!%p189_p2), 64512   ;;  %s1143_s24 = smov (!%p189_p2), 120   ;;  %vm926_vm2 = vcmask (!%p189_p2), 130048  }
   0x6   : > { %192 = sbr.rel (%p189_p2) target bundleno = 1156 (0x484), region = 36  ;;  %1061 = vmatprep.subr.mxu0 (!%p189_p2), %v1141_v0  ;;  %1063 = vmatprep.mubr.msk.f32.mxu0 (!%p189_p2), %vm1142_vm0, %v1141_v0  ;;  %s1144_s25 = smov (!%p189_p2), 112   ;;  %vm928_vm3 = vcmask (!%p189_p2), 195584   ;;  %vm930_vm4 = vcmask (!%p189_p2), 261120  }
   0x7   : > { %1066 = vmatprep.subr.mxu1 (!%p189_p2), %v1141_v0  ;;  %1068 = vmatprep.mubr.msk.f32.mxu1 (!%p189_p2), %vm1142_vm0, %v1141_v0  ;;  %s1145_s26 = smov (!%p189_p2), 104   ;;  %s1146_s7 = smov (!%p189_p2), 8  }
   0x8   : > { %s1147_s8 = smov (!%p189_p2), 16   ;;  %s1148_s9 = smov (!%p189_p2), 24  }
   0xd   : > { %s1274_s16 = smov (!%p224_p3, %s1021_s16), 1 }
   0xe   : > { %s1188_s17 = sshll.u32 %s1274_s16, 3 }
   0xf   : > { %s231_s20 = scalar_lea.vmem %s1269_s1, %s1188_s17  ;;  %s227_s23 = scalar_lea.vmem %s1268_s0, %s1188_s17 }
  0x10   : > { %v245_v1 = vld [vmem:[%s231_s20] sm:$0xff]  ;;  %s239_s29 = scalar_lea.vmem %s1271_s3, %s1188_s17  ;;  %s235_s6 = scalar_lea.vmem %s1270_s2, %s1188_s17 }
  0x11   : > { %1062 = vmatpush3.xpose.msk.msra.mxu0 %vm248_vm1, %v245_v1  ;;  %v244_v2 = vld [vmem:[%s227_s23] sm:$0xff]  ;;  %s243_s12 = scalar_lea.vmem %s1272_s4, %s1188_s17 }
  0x12   : > { %1076 = vmatprep.subr.mxu0 %v1141_v0  ;;  %411 = vrot.lane.b32.xlu1 %v244_v2, %s1143_s24  ;;  %v247_v4 = vld [vmem:[%s239_s29] sm:$0xff] }
  0x13   : > { %v246_v9 = vld [vmem:[%s235_s6] sm:$0xff] }
  0x14   : > { %1064 = vmatmul.mubr.msk.f32.vlgmr.msra.gmra.mrb[0].mxu0 %vm248_vm1, %v244_v2  ;;  %1067 = vmatpush3.msra.mxu1 %v246_v9 }
  0x15   : > { %1078 = vmatprep.mubr.msk.f32.mxu0 %vm1142_vm0, %v1141_v0  ;;  %1071 = vmatprep.subr.mxu1 %v1141_v0 }
  0x16   : > { %581 = vrot.lane.b32.xlu1 %v245_v1, %s1144_s25 }
  0x1a   : > { %579 = vrot.lane.b32.xlu1 %v244_v2, %s1144_s25 }
  0x1e   : > { %748 = vrot.lane.b32.xlu1 %v245_v1, %s1145_s26 }
  0x22   : > { %746 = vrot.lane.b32.xlu1 %v244_v2, %s1145_s26 }
  0x84   : > { %v412_v13 = vpop.permute.xlu1 %411 }
  0x88   : > { %v582_v14 = vpop.permute.xlu1 %581 }
  0x8c   : > { %v580_v17 = vpop.permute.xlu1 %579 }
  0x90   : > { %v749_v18 = vpop.permute.xlu1 %748 }
  0x94   : > { %v747_v19 = vpop.permute.xlu1 %746 }
  0xe7   : > { %v321_v3 = vpop.f32.mrb[0].mxu0 }
  0xe8   : > { %v325_v5 = vmul.f32 0.35355338, %v321_v3  ;;  %v1065_v6 = vpop.f32.mrb[1].mxu0 }
  0xea   : > { %v326_v7 = vadd.f32 %v325_v5, %v247_v4 }
  0xec   : > { %v327_v8 = vsel %vm248_vm1, %v326_v7, -inf }
  0xed   : > { %328 = vmax.xlane.f32.xlu0 %v327_v8 }
 0x103   : > { %413 = vrot.lane.b32.xlu0 %v245_v1, %s1143_s24 }
 0x17a   : > { %v329_v10 = vpop.xlane.xlu0 %328 }
 0x17b   : > { %v330_v11 = vsub.f32 %v326_v7, %v329_v10 }
 0x17d   : > { %v331_v12 = vmul.f32 1.442695, %v330_v11 }
 0x17e   : > { %v414_v15 = vpop.permute.xlu0 %413 }
 0x17f   : > { %1117 = vpow2.f32 %v331_v12 }
 0x189   : > { %v1219_v16 = vpop.eup %1117 }
 0x18a   : > { %1069 = vmatmul.mubr.msk.f32.vlgmr.msra.gmra.mrb[0].mxu1 %vm248_vm1, %v1219_v16  ;;  %v333_v55 = vsel %vm248_vm1, %v1219_v16, 0.0 }
 0x18b   : > { %1072 = vmatpush3.xpose.msk.msra.mxu1 %vm248_vm1, %v414_v15  ;;  %1073 = vmatprep.mubr.msk.f32.mxu1 %vm1142_vm0, %v1141_v0 }
 0x18c   : > { %1081 = vmatprep.subr.mxu1 %v1141_v0 }
 0x18e   : > { %1074 = vmatmul.mubr.msk.f32.vlgmr.msra.gmra.mrb[2].mxu1 %vm248_vm1, %v412_v13 }
 0x18f   : > { %1082 = vmatpush3.xpose.msk.msra.mxu1 %vm248_vm1, %v582_v14  ;;  %1083 = vmatprep.mubr.msk.f32.mxu1 %vm1142_vm0, %v1141_v0 }
 0x190   : > { %1091 = vmatprep.subr.mxu1 %v1141_v0 }
 0x192   : > { %1084 = vmatmul.mubr.msk.f32.vlgmr.msra.gmra.mrb[4].mxu1 %vm248_vm1, %v580_v17 }
 0x193   : > { %1092 = vmatpush3.xpose.msk.msra.mxu1 %vm248_vm1, %v749_v18  ;;  %1093 = vmatprep.mubr.msk.f32.mxu1 %vm1142_vm0, %v1141_v0 }
 0x196   : > { %1094 = vmatmul.mubr.msk.f32.vlgmr.msra.gmra.mrb[6].mxu1 %vm248_vm1, %v747_v19 }
 0x25d   : > { %v1237_v20 = vpop.f32.mrb[0].mxu1 }
 0x25e   : > { %v1070_v21 = vpop.f32.mrb[1].mxu1 }
 0x261   : > { %v485_v22 = vpop.f32.mrb[2].mxu1 }
 0x262   : > { %v489_v23 = vmul.f32 0.35355338, %v485_v22  ;;  %v1075_v24 = vpop.f32.mrb[3].mxu1 }
 0x264   : > { %v490_v25 = vadd.f32 %v489_v23, %v247_v4 }
 0x265   : > { %v653_v26 = vpop.f32.mrb[4].mxu1 }
 0x266   : > { %v657_v27 = vmul.f32 0.35355338, %v653_v26  ;;  %v491_v28 = vsel %vm248_vm1, %v490_v25, -inf  ;;  %v1085_v29 = vpop.f32.mrb[5].mxu1 }
 0x267   : > { %492 = vmax.xlane.f32.xlu1 %v491_v28 }
 0x268   : > { %v658_v30 = vadd.f32 %v657_v27, %v247_v4 }
 0x269   : > { %v820_v31 = vpop.f32.mrb[6].mxu1 }
 0x26a   : > { %v659_v32 = vsel %vm248_vm1, %v658_v30, -inf  ;;  %v1095_v33 = vpop.f32.mrb[7].mxu1  ;;  %v824_v34 = vmul.f32 0.35355338, %v820_v31 }
 0x26b   : > { %660 = vmax.xlane.f32.xlu0 %v659_v32 }
 0x26c   : > { %v825_v35 = vadd.f32 %v824_v34, %v247_v4 }
 0x26e   : > { %v826_v36 = vsel %vm248_vm1, %v825_v35, -inf }
 0x278   : > { %669 = vrot.lane.b32.xlu1 %v246_v9, %s1144_s25 }
 0x281   : > { %502 = vrot.lane.b32.xlu0 %v246_v9, %s1143_s24 }
 0x29c   : > { %827 = vmax.xlane.f32.xlu1 %v826_v36 }
 0x2ad   : > { %836 = vrot.lane.b32.xlu1 %v246_v9, %s1145_s26 }
 0x2f4   : > { %v493_v37 = vpop.xlane.xlu1 %492 }
 0x2f5   : > { %v494_v38 = vsub.f32 %v490_v25, %v493_v37 }
 0x2f7   : > { %v495_v39 = vmul.f32 1.442695, %v494_v38 }
 0x2f8   : > { %v661_v40 = vpop.xlane.xlu0 %660  ;;  %v670_v45 = vpop.permute.xlu1 %669 }
 0x2f9   : > { %1119 = vpow2.f32 %v495_v39  ;;  %v662_v41 = vsub.f32 %v658_v30, %v661_v40 }
 0x2fb   : > { %v663_v42 = vmul.f32 1.442695, %v662_v41 }
 0x2fc   : > { %v503_v43 = vpop.permute.xlu0 %502 }
 0x2fd   : > { %1121 = vpow2.f32 %v663_v42  ;;  %1077 = vmatpush3.msra.mxu0 %v503_v43 }
 0x2fe   : > { %1086 = vmatprep.subr.mxu0 %v1141_v0 }
 0x303   : > { %v1120_v44 = vpop.eup %1119 }
 0x304   : > { %1079 = vmatmul.mubr.msk.f32.vlgmr.msra.gmra.mrb[2].mxu0 %vm248_vm1, %v1120_v44  ;;  %v497_v46 = vsel %vm248_vm1, %v1120_v44, 0.0 }
 0x305   : > { %1087 = vmatpush3.msra.mxu0 %v670_v45  ;;  %498 = vadd.xlane.f32.xlu0 %v497_v46 }
 0x306   : > { %1088 = vmatprep.mubr.msk.f32.mxu0 %vm1142_vm0, %v1141_v0  ;;  %1096 = vmatprep.subr.mxu0 %v1141_v0 }
 0x307   : > { %v1122_v47 = vpop.eup %1121 }
 0x308   : > { %1089 = vmatmul.mubr.msk.f32.vlgmr.msra.gmra.mrb[4].mxu0 %vm248_vm1, %v1122_v47  ;;  %v665_v48 = vsel %vm248_vm1, %v1122_v47, 0.0 }
 0x309   : > { %666 = vadd.xlane.f32.xlu1 %v665_v48  ;;  %1098 = vmatprep.mubr.msk.f32.mxu0 %vm1142_vm0, %v1141_v0 }
 0x329   : > { %v828_v49 = vpop.xlane.xlu1 %827 }
 0x32a   : > { %v829_v50 = vsub.f32 %v825_v35, %v828_v49 }
 0x32c   : > { %v830_v51 = vmul.f32 1.442695, %v829_v50 }
 0x32d   : > { %v837_v52 = vpop.permute.xlu1 %836 }
 0x32e   : > { %1123 = vpow2.f32 %v830_v51  ;;  %1097 = vmatpush3.msra.mxu0 %v837_v52 }
 0x338   : > { %v1124_v53 = vpop.eup %1123 }
 0x339   : > { %1099 = vmatmul.mubr.msk.f32.vlgmr.msra.gmra.mrb[6].mxu0 %vm248_vm1, %v1124_v53  ;;  %v832_v54 = vsel %vm248_vm1, %v1124_v53, 0.0 }
 0x33a   : > { %833 = vadd.xlane.f32.xlu0 %v832_v54 }
 0x33e   : > { %334 = vadd.xlane.f32.xlu0 %v333_v55 }
 0x392   : > { %v499_v56 = vpop.xlane.xlu0 %498 }
 0x393   : > { %1125 = vrcp.f32 %v499_v56 }
 0x396   : > { %v667_v57 = vpop.xlane.xlu1 %666 }
 0x397   : > { %1127 = vrcp.f32 %v667_v57 }
 0x39d   : > { %v1126_v58 = vpop.eup %1125 }
 0x3a1   : > { %v1128_v62 = vpop.eup %1127 }
 0x3c7   : > { %v834_v2 = vpop.xlane.xlu0 %833 }
 0x3c8   : > { %1129 = vrcp.f32 %v834_v2 }
 0x3cb   : > { %v335_v7 = vpop.xlane.xlu0 %334 }
 0x3cc   : > { %1131 = vrcp.f32 %v335_v7 }
 0x3d2   : > { %v1130_v3 = vpop.eup %1129 }
 0x3d6   : > { %v1132_v8 = vpop.eup %1131 }
 0x3d7   : > { %v574_v59 = vpop.f32.mrb[2].mxu0  ;;  %v410_v10 = vmul.f32 %v1132_v8, %v1237_v20 }
 0x3d8   : > { %v578_v60 = vmul.f32 %v1126_v58, %v574_v59  ;;  %v1080_v61 = vpop.f32.mrb[3].mxu0 }
 0x3da   : > { %914 = vrot.lane.b32.xlu1 %v578_v60, %s1146_s7 }
 0x3db   : > { %v741_v63 = vpop.f32.mrb[4].mxu0 }
 0x3dc   : > { %v745_v0 = vmul.f32 %v1128_v62, %v741_v63  ;;  %v1090_v1 = vpop.f32.mrb[5].mxu0 }
 0x3de   : > { %918 = vrot.lane.b32.xlu0 %v745_v0, %s1147_s8 }
 0x40c   : > { %v908_v4 = vpop.f32.mrb[6].mxu0 }
 0x40d   : > { %v912_v5 = vmul.f32 %v1130_v3, %v908_v4  ;;  %v1100_v6 = vpop.f32.mrb[7].mxu0 }
 0x40f   : > { %922 = vrot.lane.b32.xlu1 %v912_v5, %s1148_s9 }
 0x44c   : > { %v915_v9 = vpop.permute.xlu1 %914 }
 0x44d   : > { %v925_v12 = vsel %vm248_vm1, %v410_v10, %v915_v9 }
 0x450   : > { %v919_v11 = vpop.permute.xlu0 %918 }
 0x451   : > { %v927_v13 = vsel %vm926_vm2, %v925_v12, %v919_v11 }
 0x481   : > { %v923_v14 = vpop.permute.xlu1 %922 }
 0x482   : > { %v929_v15 = vsel %vm928_vm3, %v927_v13, %v923_v14 }
 0x483   : > { %931 = vst.msk [vmem:[%s243_s12] sm:$0xff] %vm930_vm4, %v929_v15 }
 0x484 PF: > { %s14_s15 = sadd.s32 1, %s1139_s15  }
 0x485   : > { %p11_p4 = scmp.ge.s32.totalorder %s14_s15, 4  }
 0x487   :  { %13 = sbr.rel (!%p11_p4) target bundleno = 1 (0x1), region = 75 }

// kernel: fwd.40
= control target key start
LH: loop header
LB: loop body
LE: loop exit
PB: predicated region body
PF: predicated region fallthrough
CT: control target
= control target key end

     0   :  { %s382_s12 = smov 0   ;;  %s414_s0 = inlined_call_operand.vmem [shape: f32[16,32], index: 0, kind: input, shape index: {}]   ;;  %s415_s1 = inlined_call_operand.vmem [shape: f32[32,64], index: 1, kind: input, shape index: {}]   ;;  %s416_s2 = inlined_call_operand.vmem [shape: f32[1,64], index: 2, kind: input, shape index: {}]   ;;  %s417_s3 = inlined_call_operand.vmem [shape: f32[16,64], index: 3, kind: output, shape index: {}]  }
   0x1 LB: > { %s307_s13 = sadd.s32 4294967295, %s357_s12   ;;  %p311_p0 = scmp.ge.s32.totalorder %s357_s12, 1  ;;  %s357_s12 = sphi %s382_s12, %s13_s12  }
   0x2   : > { %p136_p1 = scmp.lt.s32.totalorder %s357_s12, 3 }
   0x4   : > { %p137_p2 = pnand %p311_p0, %p136_p1 }
   0x5   : > { %v167_v0 = vld [vmem:[%s415_s1] sm:$0xff] (!%p137_p2)  ;;  %v168_v1 = vld [vmem:[%s415_s1 + $0x8] sm:$0xff] (!%p137_p2)  ;;  %v169_v2 = vld [vmem:[%s415_s1 + $0x10] sm:$0xff] (!%p137_p2)  ;;  %v359_v3 = vmov (!%p137_p2), 0.0|0.0   ;;  %vm360_vm0 = vmmov (!%p137_p2), 0   ;;  %v361_v6 = vmov (!%p137_p2), 0.0  }
   0x6   : > { %140 = sbr.rel (%p137_p2) target bundleno = 232 (0xe8), region = 32  ;;  %334 = vmatprep.subr.bf16.mxu0 (!%p137_p2), %v359_v3  ;;  %v335_v4 = vpack.c.bf16 (!%p137_p2), %v168_v1, %v167_v0  ;;  %v170_v5 = vld [vmem:[%s415_s1 + $0x18] sm:$0xff] (!%p137_p2)  ;;  %331 = vmatprep.mubr.msk.f32.mxu0 (!%p137_p2), %vm360_vm0, %v361_v6  ;;  %p158_p3 = scmp.lt.s32.totalorder (!%p137_p2), %s307_s13, 1  ;;  %vm178_vm1 = vcmask (!%p137_p2), 261120   ;;  %v314_v9 = vld [vmem:[%s416_s2] ss:$0 sm:$0xff] (!%p137_p2) }
   0x7   : > { %v338_v7 = vpack.c.bf16 (!%p137_p2), %v170_v5, %v169_v2  ;;  %vm252_vm2 = vcmask (!%p137_p2), 523264  }
   0x8   : > { %336 = vmatpush3.bf16.msra.mxu0 (!%p137_p2), %v335_v4 }
   0x9   : > { %337 = vmatprep.subr.bf16.mxu0 (!%p137_p2), %v359_v3 }
   0xc   : > { %339 = vmatpush3.bf16.msra.mxu0 (!%p137_p2), %v338_v7 }
   0xd   : > { %s419_s13 = smov (!%p158_p3, %s307_s13), 1 }
   0xe   : > { %s312_s22 = sshll.u32 %s419_s13, 3 }
   0xf   : > { %s161_s25 = scalar_lea.vmem %s414_s0, %s312_s22  ;;  %s165_s30 = scalar_lea.vmem %s417_s3, %s312_s22 }
  0x10   : > { %v166_v8 = vld [vmem:[%s161_s25] sm:$0xff] }
  0x11   : > { %332 = vmatmul.mubr.msk.f32.vlgmr.msra.gmra.mrb[0].mxu0 %vm178_vm1, %v166_v8 }
  0xe4   : > { %v248_v10 = vpop.f32.mrb[0].mxu0 }
  0xe5   : > { %v249_v11 = vadd.f32 %v314_v9, %v248_v10  ;;  %v333_v12 = vpop.f32.mrb[1].mxu0 }
  0xe7   : > { %253 = vst.msk [vmem:[%s165_s30] sm:$0xff] %vm252_vm2, %v249_v11 }
  0xe8 PF: > { %s13_s12 = sadd.s32 1, %s357_s12  }
  0xe9   : > { %p10_p4 = scmp.ge.s32.totalorder %s13_s12, 4  }
  0xeb   :  { %12 = sbr.rel (!%p10_p4) target bundleno = 1 (0x1), region = 62 }

// kernel: fwd.39
= control target key start
LH: loop header
LB: loop body
LE: loop exit
PB: predicated region body
PF: predicated region fallthrough
CT: control target
= control target key end

     0   :  { %s381_s12 = smov 0   ;;  %s413_s0 = inlined_call_operand.vmem [shape: f32[16,32], index: 0, kind: input, shape index: {}]   ;;  %s414_s1 = inlined_call_operand.vmem [shape: f32[32,32], index: 1, kind: input, shape index: {}]   ;;  %s415_s2 = inlined_call_operand.vmem [shape: f32[1,32], index: 2, kind: input, shape index: {}]   ;;  %s416_s3 = inlined_call_operand.vmem [shape: f32[16,32], index: 3, kind: output, shape index: {}]  }
   0x1 LB: > { %s306_s13 = sadd.s32 4294967295, %s356_s12   ;;  %p310_p0 = scmp.ge.s32.totalorder %s356_s12, 1  ;;  %s356_s12 = sphi %s381_s12, %s13_s12  }
   0x2   : > { %p136_p1 = scmp.lt.s32.totalorder %s356_s12, 3 }
   0x4   : > { %p137_p2 = pnand %p310_p0, %p136_p1 }
   0x5   : > { %v167_v0 = vld [vmem:[%s414_s1] sm:$0xff] (!%p137_p2)  ;;  %v168_v1 = vld [vmem:[%s414_s1 + $0x8] sm:$0xff] (!%p137_p2)  ;;  %v169_v2 = vld [vmem:[%s414_s1 + $0x10] sm:$0xff] (!%p137_p2)  ;;  %v358_v3 = vmov (!%p137_p2), 0.0|0.0   ;;  %vm359_vm0 = vmmov (!%p137_p2), 0   ;;  %v360_v6 = vmov (!%p137_p2), 0.0  }
   0x6   : > { %140 = sbr.rel (%p137_p2) target bundleno = 232 (0xe8), region = 32  ;;  %333 = vmatprep.subr.bf16.mxu0 (!%p137_p2), %v358_v3  ;;  %v334_v4 = vpack.c.bf16 (!%p137_p2), %v168_v1, %v167_v0  ;;  %v170_v5 = vld [vmem:[%s414_s1 + $0x18] sm:$0xff] (!%p137_p2)  ;;  %330 = vmatprep.mubr.msk.f32.mxu0 (!%p137_p2), %vm359_vm0, %v360_v6  ;;  %p158_p3 = scmp.lt.s32.totalorder (!%p137_p2), %s306_s13, 1  ;;  %vm178_vm1 = vcmask (!%p137_p2), 261120   ;;  %v313_v9 = vld [vmem:[%s415_s2] ss:$0 sm:$0xff] (!%p137_p2) }
   0x7   : > { %v337_v7 = vpack.c.bf16 (!%p137_p2), %v170_v5, %v169_v2 }
   0x8   : > { %335 = vmatpush3.bf16.msra.mxu0 (!%p137_p2), %v334_v4 }
   0x9   : > { %336 = vmatprep.subr.bf16.mxu0 (!%p137_p2), %v358_v3 }
   0xc   : > { %338 = vmatpush3.bf16.msra.mxu0 (!%p137_p2), %v337_v7 }
   0xd   : > { %s418_s13 = smov (!%p158_p3, %s306_s13), 1 }
   0xe   : > { %s311_s22 = sshll.u32 %s418_s13, 3 }
   0xf   : > { %s161_s25 = scalar_lea.vmem %s413_s0, %s311_s22  ;;  %s165_s30 = scalar_lea.vmem %s416_s3, %s311_s22 }
  0x10   : > { %v166_v8 = vld [vmem:[%s161_s25] sm:$0xff] }
  0x11   : > { %331 = vmatmul.mubr.msk.f32.vlgmr.msra.gmra.mrb[0].mxu0 %vm178_vm1, %v166_v8 }
  0xe4   : > { %v248_v10 = vpop.f32.mrb[0].mxu0 }
  0xe5   : > { %v249_v11 = vadd.f32 %v313_v9, %v248_v10  ;;  %v332_v12 = vpop.f32.mrb[1].mxu0 }
  0xe7   : > { %252 = vst.msk [vmem:[%s165_s30] sm:$0xff] %vm178_vm1, %v249_v11 }
  0xe8 PF: > { %s13_s12 = sadd.s32 1, %s356_s12  }
  0xe9   : > { %p10_p4 = scmp.ge.s32.totalorder %s13_s12, 4  }
  0xeb   :  { %12 = sbr.rel (!%p10_p4) target bundleno = 1 (0x1), region = 62 }

// kernel: fwd.53
= control target key start
LH: loop header
LB: loop body
LE: loop exit
PB: predicated region body
PF: predicated region fallthrough
CT: control target
= control target key end

     0   :  { %s381_s12 = smov 0   ;;  %s413_s0 = inlined_call_operand.vmem [shape: f32[16,32], index: 0, kind: input, shape index: {}]   ;;  %s414_s1 = inlined_call_operand.vmem [shape: f32[32,128], index: 1, kind: input, shape index: {}]   ;;  %s415_s2 = inlined_call_operand.vmem [shape: f32[1,128], index: 2, kind: input, shape index: {}]   ;;  %s416_s3 = inlined_call_operand.vmem [shape: f32[16,128], index: 3, kind: output, shape index: {}]  }
   0x1 LB: > { %s306_s13 = sadd.s32 4294967295, %s356_s12   ;;  %p310_p0 = scmp.ge.s32.totalorder %s356_s12, 1  ;;  %s356_s12 = sphi %s381_s12, %s13_s12  }
   0x2   : > { %p136_p1 = scmp.lt.s32.totalorder %s356_s12, 3 }
   0x4   : > { %p137_p2 = pnand %p310_p0, %p136_p1 }
   0x5   : > { %v167_v0 = vld [vmem:[%s414_s1] sm:$0xff] (!%p137_p2)  ;;  %v168_v1 = vld [vmem:[%s414_s1 + $0x8] sm:$0xff] (!%p137_p2)  ;;  %v169_v2 = vld [vmem:[%s414_s1 + $0x10] sm:$0xff] (!%p137_p2)  ;;  %v358_v3 = vmov (!%p137_p2), 0.0|0.0   ;;  %vm359_vm0 = vmmov (!%p137_p2), 0   ;;  %v360_v6 = vmov (!%p137_p2), 0.0  }
   0x6   : > { %140 = sbr.rel (%p137_p2) target bundleno = 232 (0xe8), region = 32  ;;  %333 = vmatprep.subr.bf16.mxu0 (!%p137_p2), %v358_v3  ;;  %v334_v4 = vpack.c.bf16 (!%p137_p2), %v168_v1, %v167_v0  ;;  %v170_v5 = vld [vmem:[%s414_s1 + $0x18] sm:$0xff] (!%p137_p2)  ;;  %330 = vmatprep.mubr.msk.f32.mxu0 (!%p137_p2), %vm359_vm0, %v360_v6  ;;  %p158_p3 = scmp.lt.s32.totalorder (!%p137_p2), %s306_s13, 1  ;;  %vm178_vm1 = vcmask (!%p137_p2), 261120   ;;  %v313_v9 = vld [vmem:[%s415_s2] ss:$0 sm:$0xff] (!%p137_p2) }
   0x7   : > { %v337_v7 = vpack.c.bf16 (!%p137_p2), %v170_v5, %v169_v2 }
   0x8   : > { %335 = vmatpush3.bf16.msra.mxu0 (!%p137_p2), %v334_v4 }
   0x9   : > { %336 = vmatprep.subr.bf16.mxu0 (!%p137_p2), %v358_v3 }
   0xc   : > { %338 = vmatpush3.bf16.msra.mxu0 (!%p137_p2), %v337_v7 }
   0xd   : > { %s418_s13 = smov (!%p158_p3, %s306_s13), 1 }
   0xe   : > { %s311_s22 = sshll.u32 %s418_s13, 3 }
   0xf   : > { %s161_s25 = scalar_lea.vmem %s413_s0, %s311_s22  ;;  %s165_s30 = scalar_lea.vmem %s416_s3, %s311_s22 }
  0x10   : > { %v166_v8 = vld [vmem:[%s161_s25] sm:$0xff] }
  0x11   : > { %331 = vmatmul.mubr.msk.f32.vlgmr.msra.gmra.mrb[0].mxu0 %vm178_vm1, %v166_v8 }
  0xe4   : > { %v248_v10 = vpop.f32.mrb[0].mxu0 }
  0xe5   : > { %v249_v11 = vadd.f32 %v313_v9, %v248_v10  ;;  %v332_v12 = vpop.f32.mrb[1].mxu0 }
  0xe7   : > { %252 = vst [vmem:[%s165_s30] sm:$0xff] %v249_v11 }
  0xe8 PF: > { %s13_s12 = sadd.s32 1, %s356_s12  }
  0xe9   : > { %p10_p4 = scmp.ge.s32.totalorder %s13_s12, 4  }
  0xeb   :  { %12 = sbr.rel (!%p10_p4) target bundleno = 1 (0x1), region = 62 }

// kernel: fwd.35
= control target key start
LH: loop header
LB: loop body
LE: loop exit
PB: predicated region body
PF: predicated region fallthrough
CT: control target
= control target key end

     0   :  { %s301_s12 = smov 0   ;;  %s327_s0 = inlined_call_operand.vmem [shape: f32[16,32], index: 0, kind: input, shape index: {}]   ;;  %s328_s1 = inlined_call_operand.vmem [shape: f32[1,32], index: 1, kind: input, shape index: {}]   ;;  %s329_s2 = inlined_call_operand.vmem [shape: f32[1,32], index: 2, kind: input, shape index: {}]   ;;  %s330_s3 = inlined_call_operand.vmem [shape: f32[16,32], index: 3, kind: output, shape index: {}]  }
   0x1 LB: > { %s252_s13 = sadd.s32 4294967295, %s279_s12   ;;  %p256_p0 = scmp.ge.s32.totalorder %s279_s12, 1  ;;  %s279_s12 = sphi %s301_s12, %s13_s12  }
   0x2   : > { %p136_p1 = scmp.lt.s32.totalorder %s279_s12, 3 }
   0x4   : > { %p137_p2 = pnand %p256_p0, %p136_p1 }
   0x5   : > { %p158_p3 = scmp.lt.s32.totalorder (!%p137_p2), %s252_s13, 1  ;;  %vm169_vm0 = vcmask (!%p137_p2), 261120   ;;  %v259_v11 = vld [vmem:[%s328_s1] ss:$0 sm:$0xff] (!%p137_p2) }
   0x6   : > { %140 = sbr.rel (%p137_p2) target bundleno = 331 (0x14b), region = 32  ;;  %v260_v13 = vld [vmem:[%s329_s2] ss:$0 sm:$0xff] (!%p137_p2) }
   0xd   : > { %s332_s13 = smov (!%p158_p3, %s252_s13), 1 }
   0xe   : > { %s257_s14 = sshll.u32 %s332_s13, 3 }
   0xf   : > { %s161_s17 = scalar_lea.vmem %s327_s0, %s257_s14  ;;  %s165_s24 = scalar_lea.vmem %s330_s3, %s257_s14 }
  0x10   : > { %v166_v0 = vld [vmem:[%s161_s17] sm:$0xff] }
  0x11   : > { %v170_v1 = vsel %vm169_vm0, %v166_v0, 0.0 }
  0x12   : > { %171 = vadd.xlane.f32.xlu0 %v170_v1 }
  0x9f   : > { %v172_v2 = vpop.xlane.xlu0 %171 }
  0xa0   : > { %v174_v3 = vmul.f32 0.03125, %v172_v2 }
  0xa2   : > { %v175_v4 = vsub.f32 %v166_v0, %v174_v3 }
  0xa4   : > { %v176_v5 = vmul.f32 %v175_v4, %v175_v4 }
  0xa6   : > { %v177_v6 = vsel %vm169_vm0, %v176_v5, 0.0 }
  0xa7   : > { %178 = vadd.xlane.f32.xlu0 %v177_v6 }
 0x134   : > { %v179_v7 = vpop.xlane.xlu0 %178 }
 0x135   : > { %v180_v8 = vmul.f32 0.03125, %v179_v7 }
 0x137   : > { %v181_v9 = vadd.f32 1e-05, %v180_v8 }
 0x139   : > { %271 = vrsqrt.f32 %v181_v9 }
 0x143   : > { %v272_v10 = vpop.eup %271 }
 0x144   : > { %v183_v12 = vmul.f32 %v272_v10, %v175_v4 }
 0x146   : > { %v190_v14 = vmul.f32 %v259_v11, %v183_v12 }
 0x148   : > { %v197_v15 = vadd.f32 %v260_v13, %v190_v14 }
 0x14a   : > { %198 = vst.msk [vmem:[%s165_s24] sm:$0xff] %vm169_vm0, %v197_v15 }
 0x14b PF: > { %s13_s12 = sadd.s32 1, %s279_s12  }
 0x14c   : > { %p10_p4 = scmp.ge.s32.totalorder %s13_s12, 4  }
 0x14e   :  { %12 = sbr.rel (!%p10_p4) target bundleno = 1 (0x1), region = 62 }

</bundles_post_ra>
